<compile_context>
chip_gen: v5e
topology: v5e:2x2
jax: 0.10.0
libtpu: 0.0.40
codegen_flags: <defaults>
</compile_context>

<pallas_src>
import jax
import jax.numpy as jnp
from jax.experimental import pallas as pl
from jax.experimental.pallas import tpu as pltpu


def _round_up(x, m):
    return ((x + m - 1) // m) * m


def _vmem_capacity_bytes():
    """Physical VMEM per TensorCore; conservative 64 MiB if the query fails."""
    try:
        info = pltpu.get_tpu_info()
        cap = getattr(info, "vmem_capacity_bytes", None)
        if cap:
            return int(cap)
    except Exception:
        pass
    return 64 << 20


# -----------------------------------------------------------------------------
# Kernels. Grid = (token tile i [parallel], d_ffn tile j [arbitrary, last]).
# -----------------------------------------------------------------------------
def _ffn_kernel_direct(x_ref, w1_ref, b1_ref, w2_ref, b2_ref, o_ref):
    """f32 output: accumulate straight into the resident output block."""
    j = pl.program_id(1)

    @pl.when(j == 0)
    def _init():
        # Residual + output bias, in f32.
        o_ref[...] = x_ref[...].astype(jnp.float32) + b2_ref[...]

    h = jnp.dot(x_ref[...].astype(w1_ref.dtype), w1_ref[...],
                preferred_element_type=jnp.float32)
    h = jnp.maximum(h + b1_ref[...], 0.0)                       # bias + ReLU (f32)
    o_ref[...] += jnp.dot(h.astype(w2_ref.dtype), w2_ref[...],
                          preferred_element_type=jnp.float32)


def _ffn_kernel_acc(x_ref, w1_ref, b1_ref, w2_ref, b2_ref, o_ref, acc_ref):
    """Non-f32 output: f32 scratch accumulator, cast on the last d_ffn step."""
    j = pl.program_id(1)

    @pl.when(j == 0)
    def _init():
        acc_ref[...] = x_ref[...].astype(jnp.float32) + b2_ref[...]

    h = jnp.dot(x_ref[...].astype(w1_ref.dtype), w1_ref[...],
                preferred_element_type=jnp.float32)
    h = jnp.maximum(h + b1_ref[...], 0.0)
    acc_ref[...] += jnp.dot(h.astype(w2_ref.dtype), w2_ref[...],
                            preferred_element_type=jnp.float32)

    @pl.when(j == pl.num_programs(1) - 1)
    def _finalize():
        o_ref[...] = acc_ref[...].astype(o_ref.dtype)


def feed_forward(x, w1, b1, w2, b2, *, tile_n=None, tile_f=2048,
                 compute_dtype=jnp.bfloat16, cast_activations=True):
    """x: [B, S, C]. Returns x + Linear2(ReLU(Linear1(x))) (eval-mode dropout)."""
    B, S, C = x.shape
    Cw, d_ffn = w1.shape
    assert Cw == C and w2.shape == (d_ffn, C) and b1.shape == (d_ffn,) and b2.shape == (C,)
    N = B * S

    vmem_cap = _vmem_capacity_bytes()
    big_vmem = vmem_cap >= (96 << 20)          # v5e/v6e (128 MiB) vs v7x-class (64 MiB)

    # ---- token (M) tile -----------------------------------------------------
    if tile_n is None:
        tile_n = 512 if big_vmem else 256
    tile_n = max(8, (int(tile_n) // 8) * 8)    # (8,128) block-shape legality guard
    if N <= tile_n:
        tile_n = _round_up(N, 8)               # no wasted padding for small N
    else:
        if tile_n >= 256:
            tile_n = (tile_n // 256) * 256     # fill the 2x256^2 MXU M dim (v6e/v7x)
        elif tile_n >= 128:
            tile_n = (tile_n // 128) * 128
        # Shrink tile_n while padding waste exceeds ~1/8 of the padded slab.
        N_pad = _round_up(N, tile_n)
        while tile_n > 128 and (N_pad - N) * 8 > N_pad:
            cand = max(128, ((tile_n // 2) // 128) * 128)
            new_pad = _round_up(N, cand)
            if new_pad >= N_pad:
                break
            tile_n, N_pad = cand, new_pad
    N_pad = _round_up(N, tile_n)

    # ---- d_ffn (reduction) tile ---------------------------------------------
    d_ffn_pad = d_ffn
    if d_ffn <= tile_f:
        tile_f = d_ffn                          # full-dim block is always legal
    else:
        target = max(256, (tile_f // 256) * 256)
        best_exact = 0
        for step in (256, 128):                 # prefer 256-aligned (v6e/v7x MXU)
            t = (target // step) * step
            while t >= step:
                if d_ffn % t == 0:
                    best_exact = max(best_exact, t)
                    break
                t -= step
        if best_exact >= max(1024, target // 2):
            tile_f = best_exact
        else:
            # No good divisor: zero-pad d_ffn (exact no-op through relu + matmul).
            # Pick the 256-multiple tile in [512, target] with the least padding.
            best_t, best_waste = None, None
            t = target
            while t >= 512:
                waste = _round_up(d_ffn, t) - d_ffn
                if best_waste is None or waste < best_waste:
                    best_t, best_waste = t, waste
                t -= 256
            tile_f = best_t if best_t is not None else target
            d_ffn_pad = _round_up(d_ffn, tile_f)

    # ---- VMEM feedback loop ---------------------------------------------------
    xb = jnp.dtype(compute_dtype if cast_activations else x.dtype).itemsize
    ob = jnp.dtype(x.dtype).itemsize
    wb = jnp.dtype(compute_dtype).itemsize
    out_is_f32 = (jnp.dtype(x.dtype) == jnp.dtype(jnp.float32))

    def footprint(tn, tf, bufs):
        return (2 * tn * C * xb                       # x tiles (double-buffered)
                + 2 * tn * C * ob                     # out tiles (double-buffered)
                + bufs * C * tf * wb                  # W1 tile(s)
                + bufs * tf * C * wb                  # W2 tile(s)
                + 2 * tf * 4                          # b1 tile(s)
                + C * 4                               # b2
                + (0 if out_is_f32 else tn * C * 4)   # acc scratch (non-f32 out only)
                + tn * tf * 4)                        # h intermediate (f32)

    wt_bufs = 3 if big_vmem else 2
    budget = int(vmem_cap * 0.85)                     # headroom for compiler scratch
    guard = 0
    while footprint(tile_n, tile_f, wt_bufs) > budget and guard < 64:
        guard += 1
        if wt_bufs > 2:
            wt_bufs = 2
        elif tile_f % 256 == 0 and tile_f >= 512:
            tile_f //= 2                              # keeps d_ffn_pad % tile_f == 0
        elif tile_n > 128:
            tile_n = max(128, ((tile_n // 2) // 128) * 128)
            N_pad = _round_up(N, tile_n)
        elif tile_n > 8:
            tile_n = max(8, ((tile_n // 2) // 8) * 8)
            N_pad = _round_up(N, tile_n)
        else:
            break

    num_j = d_ffn_pad // tile_f
    if num_j == 1:
        wt_bufs = 1                                   # constant-index blocks: 1 buffer

    vmem_needed = footprint(tile_n, tile_f, max(wt_bufs, 1))
    vmem_limit = int(min(max(int(vmem_needed * 1.4), 32 << 20), int(vmem_cap * 0.9)))

    # ---- operand prep ---------------------------------------------------------
    act_dtype = compute_dtype if cast_activations else x.dtype
    x2 = x.reshape(N, C).astype(act_dtype)
    if N_pad != N:
        x2 = jnp.pad(x2, ((0, N_pad - N), (0, 0)))
    if d_ffn_pad != d_ffn:
        pad_f = d_ffn_pad - d_ffn
        w1 = jnp.pad(w1, ((0, 0), (0, pad_f)))
        b1 = jnp.pad(b1, ((0, pad_f),))
        w2 = jnp.pad(w2, ((0, pad_f), (0, 0)))
    w1c = w1.astype(compute_dtype)
    w2c = w2.astype(compute_dtype)
    b1_2 = b1.reshape(1, d_ffn_pad).astype(jnp.float32)
    b2_2 = b2.reshape(1, C).astype(jnp.float32)

    wt_mode = pl.Buffered(wt_bufs) if num_j > 1 else pl.Buffered(1)
    b1_mode = pl.Buffered(2) if num_j > 1 else pl.Buffered(1)
    const_mode = pl.Buffered(1)

    if out_is_f32:
        kernel = _ffn_kernel_direct
        scratch_shapes = []
    else:
        kernel = _ffn_kernel_acc
        scratch_shapes = [pltpu.VMEM((tile_n, C), jnp.float32)]

    out = pl.pallas_call(
        kernel,
        out_shape=jax.ShapeDtypeStruct((N_pad, C), x.dtype),
        grid_spec=pltpu.PrefetchScalarGridSpec(
            num_scalar_prefetch=0,
            # tokens (parallel, megacore-shardable) x d_ffn reduction (arbitrary, last)
            grid=(N_pad // tile_n, num_j),
            in_specs=[
                pl.BlockSpec((tile_n, C), lambda i, j: (i, 0)),                          # x
                pl.BlockSpec((C, tile_f), lambda i, j: (0, j), pipeline_mode=wt_mode),   # W1
                pl.BlockSpec((1, tile_f), lambda i, j: (0, j), pipeline_mode=b1_mode),   # b1
                pl.BlockSpec((tile_f, C), lambda i, j: (j, 0), pipeline_mode=wt_mode),   # W2
                pl.BlockSpec((1, C), lambda i, j: (0, 0), pipeline_mode=const_mode),     # b2
            ],
            out_specs=pl.BlockSpec((tile_n, C), lambda i, j: (i, 0)),
            scratch_shapes=scratch_shapes,
        ),
        compiler_params=pltpu.CompilerParams(
            dimension_semantics=("parallel", "arbitrary"),
            vmem_limit_bytes=vmem_limit),
    )(x2, w1c, b1_2, w2c, b2_2)

    if N_pad != N:
        out = out[:N]
    return out.reshape(B, S, C)


if __name__ == "__main__":
    # Small shapes matching the module defaults (C=256, d_ffn=1024).
    B, S, C, D_FFN = 2, 8, 256, 1024

    key = jax.random.PRNGKey(0)
    kx, k1, k2, k3, k4 = jax.random.split(key, 5)

    x = jax.random.normal(kx, (B, S, C), dtype=jnp.float32)
    # PyTorch Linear stores [out, in]; we use [in, out] so y = x @ W + b.
    w1 = jax.random.normal(k1, (C, D_FFN), dtype=jnp.float32) * 0.02
    b1 = jax.random.normal(k2, (D_FFN,), dtype=jnp.float32) * 0.02
    w2 = jax.random.normal(k3, (D_FFN, C), dtype=jnp.float32) * 0.02
    b2 = jax.random.normal(k4, (C,), dtype=jnp.float32) * 0.02

    out = feed_forward(x, w1, b1, w2, b2)
    out = jax.block_until_ready(out)

    # Pure-JAX f32 reference (eval-mode dropout == identity).
    hp = jax.lax.Precision.HIGHEST
    x2 = x.reshape(-1, C)
    h_ref = jnp.maximum(jnp.dot(x2, w1, precision=hp) + b1, 0.0)
    ref = (x2 + jnp.dot(h_ref, w2, precision=hp) + b2).reshape(B, S, C)

    assert out.shape == (B, S, C)
    # bf16 MXU operands / bf16 activation stream -> modest tolerance vs pure-f32 ref.
    assert jnp.allclose(out, ref, atol=2e-2, rtol=2e-2), "mismatch vs reference"

    print("KERNEL_OK")
</pallas_src>

<mosaic_0001>
module attributes {stable_mosaic.version = 11 : i64} {
  func.func @_ffn_kernel_direct(%arg0: i32, %arg1: i32, %arg2: memref<16x256xbf16, #tpu.memory_space<vmem>>, %arg3: memref<256x1024xbf16, #tpu.memory_space<vmem>>, %arg4: memref<1x1024xf32, #tpu.memory_space<vmem>>, %arg5: memref<1024x256xbf16, #tpu.memory_space<vmem>>, %arg6: memref<1x256xf32, #tpu.memory_space<vmem>>, %arg7: memref<16x256xf32, #tpu.memory_space<vmem>>) attributes {dimension_semantics = [#tpu.dimension_semantics<parallel>, #tpu.dimension_semantics<arbitrary>], iteration_bounds = array<i64: 1, 1>, scalar_prefetch = 0 : i64, scratch_operands = 0 : i64, tpu.core_type = #tpu.core_type<tc>, window_params = [{transform_indices = @transform_0, window_bounds = array<i64: 16, 256>}, {pipeline_mode = #tpu.pipeline_mode<synchronous>, transform_indices = @transform_1, window_bounds = array<i64: 256, 1024>}, {pipeline_mode = #tpu.pipeline_mode<synchronous>, transform_indices = @transform_2, window_bounds = array<i64: 1, 1024>}, {pipeline_mode = #tpu.pipeline_mode<synchronous>, transform_indices = @transform_3, window_bounds = array<i64: 1024, 256>}, {pipeline_mode = #tpu.pipeline_mode<synchronous>, transform_indices = @transform_4, window_bounds = array<i64: 1, 256>}, {transform_indices = @transform_5, window_bounds = array<i64: 16, 256>}]} {
    %c0_i32 = arith.constant 0 : i32
    %0 = arith.cmpi eq, %arg1, %c0_i32 : i32
    %1 = arith.extui %0 : i1 to i32
    %c0_i32_0 = arith.constant 0 : i32
    %2 = arith.cmpi ne, %1, %c0_i32_0 : i32
    scf.if %2 {
      %c0_14 = arith.constant 0 : index
      %c0_15 = arith.constant 0 : index
      %17 = vector.load %arg2[%c0_14, %c0_15] : memref<16x256xbf16, #tpu.memory_space<vmem>>, vector<16x256xbf16>
      %18 = arith.extf %17 : vector<16x256xbf16> to vector<16x256xf32>
      %c0_16 = arith.constant 0 : index
      %c0_17 = arith.constant 0 : index
      %19 = vector.load %arg6[%c0_16, %c0_17] : memref<1x256xf32, #tpu.memory_space<vmem>>, vector<1x256xf32>
      %20 = vector.broadcast %19 : vector<1x256xf32> to vector<16x256xf32>
      %21 = arith.addf %18, %20 : vector<16x256xf32>
      %c0_18 = arith.constant 0 : index
      %c0_19 = arith.constant 0 : index
      %22 = vector.load %arg7[%c0_18, %c0_19] : memref<16x256xf32, #tpu.memory_space<vmem>>, vector<16x256xf32>
      tpu.vector_store %arg7[%c0_18, %c0_19], %21 {strides = array<i32>} : memref<16x256xf32, #tpu.memory_space<vmem>>, vector<16x256xf32>,
    } else {
    }
    %c0 = arith.constant 0 : index
    %c0_1 = arith.constant 0 : index
    %3 = vector.load %arg2[%c0, %c0_1] : memref<16x256xbf16, #tpu.memory_space<vmem>>, vector<16x256xbf16>
    %c0_2 = arith.constant 0 : index
    %c0_3 = arith.constant 0 : index
    %4 = vector.load %arg3[%c0_2, %c0_3] : memref<256x1024xbf16, #tpu.memory_space<vmem>>, vector<256x1024xbf16>
    %cst = arith.constant dense<0.000000e+00> : vector<16x1024xf32>
    %5 = tpu.matmul %3, %4, %cst {dimension_numbers = #tpu.dot_dimension_numbers<[1], [0], [0], [1], [0, 0, 1, 1], [], []>} : vector<16x256xbf16>, vector<256x1024xbf16>, vector<16x1024xf32> -> vector<16x1024xf32>
    %c0_4 = arith.constant 0 : index
    %c0_5 = arith.constant 0 : index
    %6 = vector.load %arg4[%c0_4, %c0_5] : memref<1x1024xf32, #tpu.memory_space<vmem>>, vector<1x1024xf32>
    %7 = vector.broadcast %6 : vector<1x1024xf32> to vector<16x1024xf32>
    %8 = arith.addf %5, %7 : vector<16x1024xf32>
    %cst_6 = arith.constant 0.000000e+00 : f32
    %9 = vector.broadcast %cst_6 : f32 to vector<16x1024xf32>
    %10 = arith.maximumf %8, %9 : vector<16x1024xf32>
    %c0_7 = arith.constant 0 : index
    %c0_8 = arith.constant 0 : index
    %11 = vector.load %arg7[%c0_7, %c0_8] : memref<16x256xf32, #tpu.memory_space<vmem>>, vector<16x256xf32>
    %12 = arith.truncf %10 : vector<16x1024xf32> to vector<16x1024xbf16>
    %c0_9 = arith.constant 0 : index
    %c0_10 = arith.constant 0 : index
    %13 = vector.load %arg5[%c0_9, %c0_10] : memref<1024x256xbf16, #tpu.memory_space<vmem>>, vector<1024x256xbf16>
    %cst_11 = arith.constant dense<0.000000e+00> : vector<16x256xf32>
    %14 = tpu.matmul %12, %13, %cst_11 {dimension_numbers = #tpu.dot_dimension_numbers<[1], [0], [0], [1], [0, 0, 1, 1], [], []>} : vector<16x1024xbf16>, vector<1024x256xbf16>, vector<16x256xf32> -> vector<16x256xf32>
    %15 = arith.addf %11, %14 : vector<16x256xf32>
    %c0_12 = arith.constant 0 : index
    %c0_13 = arith.constant 0 : index
    %16 = vector.load %arg7[%c0_12, %c0_13] : memref<16x256xf32, #tpu.memory_space<vmem>>, vector<16x256xf32>
    tpu.vector_store %arg7[%c0_12, %c0_13], %15 {strides = array<i32>} : memref<16x256xf32, #tpu.memory_space<vmem>>, vector<16x256xf32>,
    return
  }
  func.func @transform_0(%arg0: i32, %arg1: i32) -> (i32, i32) {
    %c0_i32 = arith.constant 0 : i32
    %c0_i32_0 = arith.constant 0 : i32
    return %arg0, %c0_i32 : i32, i32
  }
  func.func @transform_1(%arg0: i32, %arg1: i32) -> (i32, i32) {
    %c0_i32 = arith.constant 0 : i32
    %c0_i32_0 = arith.constant 0 : i32
    return %c0_i32, %arg1 : i32, i32
  }
  func.func @transform_2(%arg0: i32, %arg1: i32) -> (i32, i32) {
    %c0_i32 = arith.constant 0 : i32
    %c0_i32_0 = arith.constant 0 : i32
    return %c0_i32, %arg1 : i32, i32
  }
  func.func @transform_3(%arg0: i32, %arg1: i32) -> (i32, i32) {
    %c0_i32 = arith.constant 0 : i32
    %c0_i32_0 = arith.constant 0 : i32
    return %arg1, %c0_i32 : i32, i32
  }
  func.func @transform_4(%arg0: i32, %arg1: i32) -> (i32, i32) {
    %c0_i32 = arith.constant 0 : i32
    %c0_i32_0 = arith.constant 0 : i32
    %c0_i32_1 = arith.constant 0 : i32
    return %c0_i32, %c0_i32_0 : i32, i32
  }
  func.func @transform_5(%arg0: i32, %arg1: i32) -> (i32, i32) {
    %c0_i32 = arith.constant 0 : i32
    %c0_i32_0 = arith.constant 0 : i32
    return %arg0, %c0_i32 : i32, i32
  }
}

</mosaic_0001>

<bundles_post_ra>
// kernel: tpu_custom_call.1
= control target key start
LH: loop header
LB: loop body
LE: loop exit
PB: predicated region body
PF: predicated region fallthrough
CT: control target
= control target key end

     0   :  { %10 = vsyncpa [#allocation3], 0  ;;  %s3731_s0 = inlined_call_operand.hbm [shape: bf16[16,256], index: 0, kind: input, shape index: {}]   ;;  %s3732_s1 = inlined_call_operand.hbm [shape: bf16[256,1024], index: 1, kind: input, shape index: {}]   ;;  %s3733_s2 = inlined_call_operand.hbm [shape: f32[1,1024], index: 2, kind: input, shape index: {}]   ;;  %s3734_s3 = inlined_call_operand.hbm [shape: bf16[1024,256], index: 3, kind: input, shape index: {}]   ;;  %s3735_s4 = inlined_call_operand.vmem [shape: f32[1,256], index: 4, kind: input, shape index: {}]   ;;  %s3736_s5 = inlined_call_operand.hbm [shape: f32[16,256], index: 5, kind: output, shape index: {}]  }
   0x1   :  { %11 = vsyncpa [#allocation6], 0 }
   0x2   :  { %12 = vsyncpa [#allocation9], 0  ;;  %s31_s20 = sshll.u32 %s3732_s1, 4  ;;  %s32_s20 = int_to_ptr.hbm [resolvable:$true] %s31_s20 }
   0x3   :  { %13 = vsyncpa [#allocation4], 0  ;;  %s3606_s21 = smov [#allocation5]   ;;  %s18_s25 = sshll.u32 %s3731_s0, 4  ;;  %s19_s25 = int_to_ptr.hbm [resolvable:$true] %s18_s25 }
   0x4   :  { %s33_s22 = sshll.u32 %s3606_s21, 4  ;;  %s3607_s26 = smov 512   ;;  %s34_s22 = int_to_ptr.vmem [resolvable:$true] %s33_s22 }
   0x5   :  { %s3608_s27 = smov 32   ;;  %s3609_s28 = smov [#allocation2]  }
   0x6   :  { %39 = dma.hbm_to_vmem [thread:$0]  %s32_s20, 16384, %s34_s22, [#allocation6], %s3607_s26, %s3607_s26, %s3608_s27  }
   0x7   :  { %s20_s29 = sshll.u32 %s3609_s28, 4  ;;  %s3610_s30 = smov 128   ;;  %s21_s29 = int_to_ptr.vmem [resolvable:$true] %s20_s29 }
   0x8   :  { %s3611_s6 = smov 8   ;;  %s45_s8 = sshll.u32 %s3733_s2, 4  ;;  %s46_s8 = int_to_ptr.hbm [resolvable:$true] %s45_s8 }
   0x9   :  { %26 = dma.hbm_to_vmem [thread:$0]  %s19_s25, 256, %s21_s29, [#allocation3], %s3610_s30, %s3610_s30, %s3611_s6  }
   0xa   :  { %s3612_s9 = smov [#allocation7]   ;;  %s55_s12 = sshll.u32 %s3734_s3, 4  ;;  %s56_s12 = int_to_ptr.hbm [resolvable:$true] %s55_s12 }
   0xb   :  { %s47_s10 = sshll.u32 %s3612_s9, 4  ;;  %s3613_s13 = smov [#allocation8]   ;;  %s48_s10 = int_to_ptr.vmem [resolvable:$true] %s47_s10 }
   0xc   :  { %50 = dma.hbm_to_vmem [thread:$0]  %s46_s8, 128, %s48_s10, [#allocation6]  }
   0xd   :  { %s57_s14 = sshll.u32 %s3613_s13, 4  ;;  %s58_s14 = int_to_ptr.vmem [resolvable:$true] %s57_s14 }
   0xe   :  { %63 = dma.hbm_to_vmem [thread:$0]  %s56_s12, 16384, %s58_s14, [#allocation9], %s3610_s30, %s3610_s30, %s3611_s6  }
   0xf   :  { %3598 = dma.done.wait [#allocation3], 256  }
  0x10   :  { %3599 = vsyncadd [#allocation3], 4294967040 }
  0x11   :  { %3600 = dma.done.wait [#allocation6], 16512  }
  0x12   :  { %3601 = vsyncadd [#allocation6], 4294950784 }
  0x13   :  { %3602 = dma.done.wait [#allocation9], 16384  }
  0x14   :  { %3603 = vsyncadd [#allocation9], 4294950912  ;;  %v2411_v0 = vld [vmem:[#allocation5 + $0x1c0] sm:$0xf]  ;;  %v3267_v5 = vld [vmem:[#allocation5 + $0x1c4] sm:$0xf] }
  0x15   :  { %v3271_v1 = vld [vmem:[#allocation5 + $0x1dc] sm:$0xf0]  ;;  %v2413_v6 = vld [vmem:[#allocation5 + $0x1e0] sm:$0xf0]  ;;  %s2162_s18 = sshll.u32 %s3736_s5, 4  ;;  %s3615_s19 = smov 256   ;;  %s2163_s18 = int_to_ptr.hbm [resolvable:$true] %s2162_s18 }
  0x16   :  { %v2667_v2 = vld [vmem:[#allocation5 + $0x3c0] sm:$0xf]  ;;  %v2412_v3 = vor.u32 %v3271_v1, %v2411_v0  ;;  %v2416_v8 = vor.u32 %v3267_v5, %v2413_v6  ;;  %v3331_v9 = vld [vmem:[#allocation5 + $0x3c4] sm:$0xf]  ;;  %s3616_s20 = smov 16  }
  0x17   :  { %v3335_v4 = vld [vmem:[#allocation5 + $0x3dc] sm:$0xf0]  ;;  %v2669_v10 = vld [vmem:[#allocation5 + $0x3e0] sm:$0xf0] }
  0x18   :  { %v2668_v7 = vor.u32 %v3335_v4, %v2667_v2  ;;  %v2379_v11 = vld [vmem:[#allocation5 + $0x180] sm:$0xf]  ;;  %904 = vmatpush.bf16.msra.mxu0 %v2412_v3  ;;  %v2672_v12 = vor.u32 %v3331_v9, %v2669_v10  ;;  %932 = vmatpush.bf16.msra.mxu2 %v2416_v8  ;;  %v3259_v18 = vld [vmem:[#allocation5 + $0x184] sm:$0xf] }
  0x19   :  { %v3263_v13 = vld [vmem:[#allocation5 + $0x19c] sm:$0xf0]  ;;  %v2381_v19 = vld [vmem:[#allocation5 + $0x1a0] sm:$0xf0] }
  0x1a   :  { %v2635_v14 = vld [vmem:[#allocation5 + $0x380] sm:$0xf]  ;;  %918 = vmatpush.bf16.msra.mxu1 %v2668_v7  ;;  %v2380_v16 = vor.u32 %v3263_v13, %v2379_v11  ;;  %v3323_v20 = vld [vmem:[#allocation5 + $0x384] sm:$0xf]  ;;  %946 = vmatpush.bf16.msra.mxu3 %v2672_v12  ;;  %v2384_v21 = vor.u32 %v3259_v18, %v2381_v19 }
  0x1b   :  { %v3327_v15 = vld [vmem:[#allocation5 + $0x39c] sm:$0xf0]  ;;  %v2637_v22 = vld [vmem:[#allocation5 + $0x3a0] sm:$0xf0] }
  0x1c   :  { %v2636_v17 = vor.u32 %v3327_v15, %v2635_v14  ;;  %v2347_v23 = vld [vmem:[#allocation5 + $0x140] sm:$0xf]  ;;  %v2640_v25 = vor.u32 %v3323_v20, %v2637_v22  ;;  %v3251_v28 = vld [vmem:[#allocation5 + $0x144] sm:$0xf]  ;;  %905 = vmatpush.bf16.msra.mxu0 %v2380_v16  ;;  %933 = vmatpush.bf16.msra.mxu2 %v2384_v21 }
  0x1d   :  { %v3255_v24 = vld [vmem:[#allocation5 + $0x15c] sm:$0xf0]  ;;  %v2349_v30 = vld [vmem:[#allocation5 + $0x160] sm:$0xf0] }
  0x1e   :  { %v2603_v26 = vld [vmem:[#allocation5 + $0x340] sm:$0xf]  ;;  %v2348_v29 = vor.u32 %v3255_v24, %v2347_v23  ;;  %v3315_v31 = vld [vmem:[#allocation5 + $0x344] sm:$0xf]  ;;  %919 = vmatpush.bf16.msra.mxu1 %v2636_v17  ;;  %v2352_v34 = vor.u32 %v3251_v28, %v2349_v30  ;;  %947 = vmatpush.bf16.msra.mxu3 %v2640_v25  ;;  %v2419_v28 = vld [vmem:[#allocation5 + $0x1c8] sm:$0xf] }
  0x1f   :  { %v3319_v27 = vld [vmem:[#allocation5 + $0x35c] sm:$0xf0]  ;;  %v2605_v32 = vld [vmem:[#allocation5 + $0x360] sm:$0xf0]  ;;  %v2675_v30 = vld [vmem:[#allocation5 + $0x3c8] sm:$0xf] }
  0x20   :  { %v2604_v33 = vor.u32 %v3319_v27, %v2603_v26  ;;  %v2315_v35 = vld [vmem:[#allocation5 + $0x100] sm:$0xf]  ;;  %v2608_v38 = vor.u32 %v3315_v31, %v2605_v32  ;;  %v3243_v40 = vld [vmem:[#allocation5 + $0x104] sm:$0xf]  ;;  %906 = vmatpush.bf16.msra.mxu0 %v2348_v29  ;;  %934 = vmatpush.bf16.msra.mxu2 %v2352_v34  ;;  %v3272_v29 = vld [vmem:[#allocation5 + $0x1e4] sm:$0xf0] }
  0x21   :  { %v3247_v36 = vld [vmem:[#allocation5 + $0x11c] sm:$0xf0]  ;;  %v2317_v41 = vld [vmem:[#allocation5 + $0x120] sm:$0xf0]  ;;  %v3336_v32 = vld [vmem:[#allocation5 + $0x3e4] sm:$0xf0] }
  0x22   :  { %v2571_v37 = vld [vmem:[#allocation5 + $0x300] sm:$0xf]  ;;  %v3307_v42 = vld [vmem:[#allocation5 + $0x304] sm:$0xf]  ;;  %v2316_v44 = vor.u32 %v3247_v36, %v2315_v35  ;;  %920 = vmatpush.bf16.msra.mxu1 %v2604_v33  ;;  %v2320_v46 = vor.u32 %v3243_v40, %v2317_v41  ;;  %948 = vmatpush.bf16.msra.mxu3 %v2608_v38  ;;  %v3268_v33 = vld [vmem:[#allocation5 + $0x1cc] sm:$0xf]  ;;  %v2420_v40 = vor.u32 %v3272_v29, %v2419_v28 }
  0x23   :  { %v3311_v39 = vld [vmem:[#allocation5 + $0x31c] sm:$0xf0]  ;;  %v2573_v43 = vld [vmem:[#allocation5 + $0x320] sm:$0xf0]  ;;  %v2421_v34 = vld [vmem:[#allocation5 + $0x1e8] sm:$0xf0] }
  0x24   :  { %v2572_v45 = vor.u32 %v3311_v39, %v2571_v37  ;;  %v2283_v47 = vld [vmem:[#allocation5 + $0xc0] sm:$0xf]  ;;  %v2576_v50 = vor.u32 %v3307_v42, %v2573_v43  ;;  %v3235_v52 = vld [vmem:[#allocation5 + $0xc4] sm:$0xf]  ;;  %907 = vmatpush.bf16.msra.mxu0 %v2316_v44  ;;  %935 = vmatpush.bf16.msra.mxu2 %v2320_v46  ;;  %v3332_v37 = vld [vmem:[#allocation5 + $0x3cc] sm:$0xf]  ;;  %v2676_v43 = vor.u32 %v3336_v32, %v2675_v30 }
  0x25   :  { %v3239_v48 = vld [vmem:[#allocation5 + $0xdc] sm:$0xf0]  ;;  %v2285_v53 = vld [vmem:[#allocation5 + $0xe0] sm:$0xf0]  ;;  %v2677_v38 = vld [vmem:[#allocation5 + $0x3e8] sm:$0xf0]  ;;  %v2424_v44 = vor.u32 %v3268_v33, %v2421_v34 }
  0x26   :  { %v2539_v49 = vld [vmem:[#allocation5 + $0x2c0] sm:$0xf]  ;;  %v3299_v54 = vld [vmem:[#allocation5 + $0x2c4] sm:$0xf]  ;;  %v2284_v56 = vor.u32 %v3239_v48, %v2283_v47  ;;  %921 = vmatpush.bf16.msra.mxu1 %v2572_v45  ;;  %v2288_v58 = vor.u32 %v3235_v52, %v2285_v53  ;;  %949 = vmatpush.bf16.msra.mxu3 %v2576_v50  ;;  %v2179_v41 = vld [vmem:[#allocation2] sm:$0xf]  ;;  %v2680_v48 = vor.u32 %v3332_v37, %v2677_v38 }
  0x27   :  { %v3303_v51 = vld [vmem:[#allocation5 + $0x2dc] sm:$0xf0]  ;;  %v2541_v55 = vld [vmem:[#allocation5 + $0x2e0] sm:$0xf0]  ;;  %v3210_v42 = vld [vmem:[#allocation2 + $0x4] sm:$0xf0] }
  0x28   :  { %v2540_v57 = vor.u32 %v3303_v51, %v2539_v49  ;;  %v2251_v59 = vld [vmem:[#allocation5 + $0x80] sm:$0xf]  ;;  %v2544_v62 = vor.u32 %v3299_v54, %v2541_v55  ;;  %v3227_v0 = vld [vmem:[#allocation5 + $0x84] sm:$0xf]  ;;  %908 = vmatpush.bf16.msra.mxu0 %v2284_v56  ;;  %936 = vmatpush.bf16.msra.mxu2 %v2288_v58  ;;  %v2387_v45 = vld [vmem:[#allocation5 + $0x188] sm:$0xf]  ;;  %v3659_v52 = vor.u32 %v3210_v42, %v2179_v41 }
  0x29   :  { %v3231_v60 = vld [vmem:[#allocation5 + $0x9c] sm:$0xf0]  ;;  %v2253_v1 = vld [vmem:[#allocation5 + $0xa0] sm:$0xf0]  ;;  %v3264_v46 = vld [vmem:[#allocation5 + $0x1a4] sm:$0xf0] }
  0x2a   :  { %v2507_v61 = vld [vmem:[#allocation5 + $0x280] sm:$0xf]  ;;  %v3291_v2 = vld [vmem:[#allocation5 + $0x284] sm:$0xf]  ;;  %v2252_v4 = vor.u32 %v3231_v60, %v2251_v59  ;;  %922 = vmatpush.bf16.msra.mxu1 %v2540_v57  ;;  %v2256_v6 = vor.u32 %v3227_v0, %v2253_v1  ;;  %950 = vmatpush.bf16.msra.mxu3 %v2544_v62  ;;  %v2643_v47 = vld [vmem:[#allocation5 + $0x388] sm:$0xf]  ;;  %v2388_v56 = vor.u32 %v3264_v46, %v2387_v45 }
  0x2b   :  { %v3295_v63 = vld [vmem:[#allocation5 + $0x29c] sm:$0xf0]  ;;  %v2509_v3 = vld [vmem:[#allocation5 + $0x2a0] sm:$0xf0]  ;;  %v3328_v49 = vld [vmem:[#allocation5 + $0x3a4] sm:$0xf0] }
  0x2c   :  { %v2508_v5 = vor.u32 %v3295_v63, %v2507_v61  ;;  %v2219_v7 = vld [vmem:[#allocation5 + $0x40] sm:$0xf]  ;;  %v2512_v10 = vor.u32 %v3291_v2, %v2509_v3  ;;  %v3219_v12 = vld [vmem:[#allocation5 + $0x44] sm:$0xf]  ;;  %909 = vmatpush.bf16.msra.mxu0 %v2252_v4  ;;  %937 = vmatpush.bf16.msra.mxu2 %v2256_v6  ;;  %v3260_v50 = vld [vmem:[#allocation5 + $0x18c] sm:$0xf]  ;;  %v2644_v58 = vor.u32 %v3328_v49, %v2643_v47 }
  0x2d   :  { %v3223_v8 = vld [vmem:[#allocation5 + $0x5c] sm:$0xf0]  ;;  %v2221_v13 = vld [vmem:[#allocation5 + $0x60] sm:$0xf0]  ;;  %v2389_v51 = vld [vmem:[#allocation5 + $0x1a8] sm:$0xf0] }
  0x2e   :  { %v2475_v9 = vld [vmem:[#allocation5 + $0x240] sm:$0xf]  ;;  %v3283_v14 = vld [vmem:[#allocation5 + $0x244] sm:$0xf]  ;;  %v2220_v16 = vor.u32 %v3223_v8, %v2219_v7  ;;  %923 = vmatpush.bf16.msra.mxu1 %v2508_v5  ;;  %v2224_v20 = vor.u32 %v3219_v12, %v2221_v13  ;;  %951 = vmatpush.bf16.msra.mxu3 %v2512_v10  ;;  %v3324_v53 = vld [vmem:[#allocation5 + $0x38c] sm:$0xf]  ;;  %v2392_v59 = vor.u32 %v3260_v50, %v2389_v51 }
  0x2f   :  { %v3287_v11 = vld [vmem:[#allocation5 + $0x25c] sm:$0xf0]  ;;  %v2477_v15 = vld [vmem:[#allocation5 + $0x260] sm:$0xf0]  ;;  %v2645_v54 = vld [vmem:[#allocation5 + $0x3a8] sm:$0xf0] }
  0x30   :  { %v2187_v17 = vld [vmem:[#allocation5] sm:$0xf]  ;;  %v2476_v19 = vor.u32 %v3287_v11, %v2475_v9  ;;  %v3211_v23 = vld [vmem:[#allocation5 + $0x4] sm:$0xf]  ;;  %v2480_v24 = vor.u32 %v3283_v14, %v2477_v15  ;;  %910 = vmatpush.bf16.msra.mxu0 %v2220_v16  ;;  %938 = vmatpush.bf16.msra.mxu2 %v2224_v20  ;;  %v3209_v55 = vld [vmem:[#allocation2 + $0x4] sm:$0xf]  ;;  %v2648_v0 = vor.u32 %v3324_v53, %v2645_v54 }
  0x31   :  { %v3215_v18 = vld [vmem:[#allocation5 + $0x1c] sm:$0xf0]  ;;  %v2189_v25 = vld [vmem:[#allocation5 + $0x20] sm:$0xf0]  ;;  %v2181_v57 = vld [vmem:[#allocation2 + $0x8] sm:$0xf0] }
  0x32   :  { %v2443_v21 = vld [vmem:[#allocation5 + $0x200] sm:$0xf]  ;;  %v3275_v26 = vld [vmem:[#allocation5 + $0x204] sm:$0xf]  ;;  %v2188_v31 = vor.u32 %v3215_v18, %v2187_v17  ;;  %924 = vmatpush.bf16.msra.mxu1 %v2476_v19  ;;  %v2192_v36 = vor.u32 %v3211_v23, %v2189_v25  ;;  %952 = vmatpush.bf16.msra.mxu3 %v2480_v24  ;;  %v2355_v60 = vld [vmem:[#allocation5 + $0x148] sm:$0xf]  ;;  %v3661_v63 = vor.u32 %v3209_v55, %v2181_v57 }
  0x33   :  { %v3279_v22 = vld [vmem:[#allocation5 + $0x21c] sm:$0xf0]  ;;  %v2445_v27 = vld [vmem:[#allocation5 + $0x220] sm:$0xf0]  ;;  %v3256_v61 = vld [vmem:[#allocation5 + $0x164] sm:$0xf0] }
  0x34   :  { %v2444_v35 = vor.u32 %v3279_v22, %v2443_v21  ;;  %v2448_v39 = vor.u32 %v3275_v26, %v2445_v27  ;;  %911 = vmatpush.bf16.msra.mxu0 %v2188_v31  ;;  %939 = vmatpush.bf16.msra.mxu2 %v2192_v36  ;;  %v2611_v62 = vld [vmem:[#allocation5 + $0x348] sm:$0xf]  ;;  %v3252_v2 = vld [vmem:[#allocation5 + $0x14c] sm:$0xf]  ;;  %v2356_v6 = vor.u32 %v3256_v61, %v2355_v60 }
  0x35   :  { %v3320_v1 = vld [vmem:[#allocation5 + $0x364] sm:$0xf0]  ;;  %v2357_v3 = vld [vmem:[#allocation5 + $0x168] sm:$0xf0] }
  0x36   :  { %925 = vmatpush.bf16.msra.mxu1 %v2444_v35  ;;  %953 = vmatpush.bf16.msra.mxu3 %v2448_v39  ;;  %v3316_v4 = vld [vmem:[#allocation5 + $0x34c] sm:$0xf]  ;;  %v2612_v7 = vor.u32 %v3320_v1, %v2611_v62  ;;  %v2360_v8 = vor.u32 %v3252_v2, %v2357_v3  ;;  %v2323_v9 = vld [vmem:[#allocation5 + $0x108] sm:$0xf] }
  0x37   :  { %940 = vmatmul.bf16.vlgmr.msra.gmra.mxu2 %v3659_v52  ;;  %v2613_v5 = vld [vmem:[#allocation5 + $0x368] sm:$0xf0]  ;;  %912 = vmatmul.bf16.vlgmr.msra.gmra.mxu0 %v3659_v52  ;;  %v3248_v10 = vld [vmem:[#allocation5 + $0x124] sm:$0xf0] }
  0x38   :  { %960 = vmatpush.bf16.msrb.mxu0 %v2420_v40  ;;  %988 = vmatpush.bf16.msrb.mxu2 %v2424_v44  ;;  %v2579_v11 = vld [vmem:[#allocation5 + $0x308] sm:$0xf]  ;;  %v2616_v12 = vor.u32 %v3316_v4, %v2613_v5  ;;  %v3244_v14 = vld [vmem:[#allocation5 + $0x10c] sm:$0xf]  ;;  %v2324_v18 = vor.u32 %v3248_v10, %v2323_v9  ;;  %v2427_v4 = vld [vmem:[#allocation5 + $0x1d0] sm:$0xf] }
  0x39   :  { %954 = vmatmul.bf16.vlgmr.msra.gmra.mxu3 %v3661_v63  ;;  %926 = vmatmul.bf16.vlgmr.msra.gmra.mxu1 %v3661_v63  ;;  %v3312_v13 = vld [vmem:[#allocation5 + $0x324] sm:$0xf0]  ;;  %v2325_v15 = vld [vmem:[#allocation5 + $0x128] sm:$0xf0]  ;;  %v3273_v5 = vld [vmem:[#allocation5 + $0x1ec] sm:$0xf0] }
  0x3a   :  { %974 = vmatpush.bf16.msrb.mxu1 %v2676_v43  ;;  %1002 = vmatpush.bf16.msrb.mxu3 %v2680_v48  ;;  %v3308_v16 = vld [vmem:[#allocation5 + $0x30c] sm:$0xf]  ;;  %v2580_v19 = vor.u32 %v3312_v13, %v2579_v11  ;;  %v2328_v20 = vor.u32 %v3244_v14, %v2325_v15  ;;  %v2291_v21 = vld [vmem:[#allocation5 + $0xc8] sm:$0xf]  ;;  %v3269_v9 = vld [vmem:[#allocation5 + $0x1d4] sm:$0xf] }
  0x3b   :  { %v2581_v17 = vld [vmem:[#allocation5 + $0x328] sm:$0xf0]  ;;  %v3240_v22 = vld [vmem:[#allocation5 + $0xe4] sm:$0xf0]  ;;  %v2429_v10 = vld [vmem:[#allocation5 + $0x1f0] sm:$0xf0] }
  0x3c   :  { %961 = vmatpush.bf16.msrb.mxu0 %v2388_v56  ;;  %989 = vmatpush.bf16.msrb.mxu2 %v2392_v59  ;;  %v2547_v23 = vld [vmem:[#allocation5 + $0x2c8] sm:$0xf]  ;;  %v2584_v24 = vor.u32 %v3308_v16, %v2581_v17  ;;  %v3236_v26 = vld [vmem:[#allocation5 + $0xcc] sm:$0xf]  ;;  %v2292_v30 = vor.u32 %v3240_v22, %v2291_v21  ;;  %v3333_v13 = vld [vmem:[#allocation5 + $0x3d4] sm:$0xf]  ;;  %v2428_v16 = vor.u32 %v3273_v5, %v2427_v4 }
  0x3d   :  { %v3304_v25 = vld [vmem:[#allocation5 + $0x2e4] sm:$0xf0]  ;;  %v2293_v27 = vld [vmem:[#allocation5 + $0xe8] sm:$0xf0]  ;;  %v2685_v14 = vld [vmem:[#allocation5 + $0x3f0] sm:$0xf0] }
  0x3e   :  { %975 = vmatpush.bf16.msrb.mxu1 %v2644_v58  ;;  %1003 = vmatpush.bf16.msrb.mxu3 %v2648_v0  ;;  %v3300_v28 = vld [vmem:[#allocation5 + $0x2cc] sm:$0xf]  ;;  %v2548_v31 = vor.u32 %v3304_v25, %v2547_v23  ;;  %v2296_v32 = vor.u32 %v3236_v26, %v2293_v27  ;;  %v2259_v33 = vld [vmem:[#allocation5 + $0x88] sm:$0xf]  ;;  %v2651_v21 = vld [vmem:[#allocation5 + $0x390] sm:$0xf]  ;;  %v2688_v22 = vor.u32 %v3333_v13, %v2685_v14 }
  0x3f   :  { %v2549_v29 = vld [vmem:[#allocation5 + $0x2e8] sm:$0xf0]  ;;  %v3232_v34 = vld [vmem:[#allocation5 + $0xa4] sm:$0xf0]  ;;  %v3329_v23 = vld [vmem:[#allocation5 + $0x3ac] sm:$0xf0] }
  0x40   :  { %962 = vmatpush.bf16.msrb.mxu0 %v2356_v6  ;;  %990 = vmatpush.bf16.msrb.mxu2 %v2360_v8  ;;  %v2515_v35 = vld [vmem:[#allocation5 + $0x288] sm:$0xf]  ;;  %v2552_v36 = vor.u32 %v3300_v28, %v2549_v29  ;;  %v3228_v38 = vld [vmem:[#allocation5 + $0x8c] sm:$0xf]  ;;  %v2260_v42 = vor.u32 %v3232_v34, %v2259_v33  ;;  %v2683_v6 = vld [vmem:[#allocation5 + $0x3d0] sm:$0xf]  ;;  %v2652_v29 = vor.u32 %v3329_v23, %v2651_v21 }
  0x41   :  { %v3296_v37 = vld [vmem:[#allocation5 + $0x2a4] sm:$0xf0]  ;;  %v2261_v39 = vld [vmem:[#allocation5 + $0xa8] sm:$0xf0]  ;;  %v3337_v8 = vld [vmem:[#allocation5 + $0x3ec] sm:$0xf0] }
  0x42   :  { %976 = vmatpush.bf16.msrb.mxu1 %v2612_v7  ;;  %1004 = vmatpush.bf16.msrb.mxu3 %v2616_v12  ;;  %v3292_v40 = vld [vmem:[#allocation5 + $0x28c] sm:$0xf]  ;;  %v2516_v43 = vor.u32 %v3296_v37, %v2515_v35  ;;  %v2264_v44 = vor.u32 %v3228_v38, %v2261_v39  ;;  %v2227_v45 = vld [vmem:[#allocation5 + $0x48] sm:$0xf]  ;;  %v2684_v17 = vor.u32 %v3337_v8, %v2683_v6  ;;  %v2397_v25 = vld [vmem:[#allocation5 + $0x1b0] sm:$0xf0] }
  0x43   :  { %v2517_v41 = vld [vmem:[#allocation5 + $0x2a8] sm:$0xf0]  ;;  %v3224_v46 = vld [vmem:[#allocation5 + $0x64] sm:$0xf0]  ;;  %v3325_v26 = vld [vmem:[#allocation5 + $0x394] sm:$0xf] }
  0x44   :  { %963 = vmatpush.bf16.msrb.mxu0 %v2324_v18  ;;  %991 = vmatpush.bf16.msrb.mxu2 %v2328_v20  ;;  %v2483_v47 = vld [vmem:[#allocation5 + $0x248] sm:$0xf]  ;;  %v2520_v48 = vor.u32 %v3292_v40, %v2517_v41  ;;  %v3220_v50 = vld [vmem:[#allocation5 + $0x4c] sm:$0xf]  ;;  %v2228_v55 = vor.u32 %v3224_v46, %v2227_v45  ;;  %v2432_v18 = vor.u32 %v3269_v9, %v2429_v10  ;;  %v3265_v20 = vld [vmem:[#allocation5 + $0x1ac] sm:$0xf0] }
  0x45   :  { %v3288_v49 = vld [vmem:[#allocation5 + $0x264] sm:$0xf0]  ;;  %v2229_v51 = vld [vmem:[#allocation5 + $0x68] sm:$0xf0]  ;;  %v2653_v27 = vld [vmem:[#allocation5 + $0x3b0] sm:$0xf0] }
  0x46   :  { %977 = vmatpush.bf16.msrb.mxu1 %v2580_v19  ;;  %1005 = vmatpush.bf16.msrb.mxu3 %v2584_v24  ;;  %v3284_v53 = vld [vmem:[#allocation5 + $0x24c] sm:$0xf]  ;;  %v2195_v56 = vld [vmem:[#allocation5 + $0x8] sm:$0xf]  ;;  %v2484_v58 = vor.u32 %v3288_v49, %v2483_v47  ;;  %v2232_v59 = vor.u32 %v3220_v50, %v2229_v51  ;;  %v2395_v19 = vld [vmem:[#allocation5 + $0x190] sm:$0xf]  ;;  %v2656_v34 = vor.u32 %v3325_v26, %v2653_v27 }
  0x47   :  { %v2485_v54 = vld [vmem:[#allocation5 + $0x268] sm:$0xf0]  ;;  %v3216_v57 = vld [vmem:[#allocation5 + $0x24] sm:$0xf0]  ;;  %v3261_v24 = vld [vmem:[#allocation5 + $0x194] sm:$0xf]  ;;  %v2396_v28 = vor.u32 %v3265_v20, %v2395_v19 }
  0x48   :  { %964 = vmatpush.bf16.msrb.mxu0 %v2292_v30  ;;  %992 = vmatpush.bf16.msrb.mxu2 %v2296_v32  ;;  %v2451_v60 = vld [vmem:[#allocation5 + $0x208] sm:$0xf]  ;;  %v3212_v62 = vld [vmem:[#allocation5 + $0xc] sm:$0xf]  ;;  %v2488_v0 = vor.u32 %v3284_v53, %v2485_v54  ;;  %v2196_v7 = vor.u32 %v3216_v57, %v2195_v56  ;;  %v2400_v30 = vor.u32 %v3261_v24, %v2397_v25  ;;  %v3257_v32 = vld [vmem:[#allocation5 + $0x16c] sm:$0xf0] }
  0x49   :  { %v3280_v61 = vld [vmem:[#allocation5 + $0x224] sm:$0xf0]  ;;  %v2197_v1 = vld [vmem:[#allocation5 + $0x28] sm:$0xf0]  ;;  %v2619_v33 = vld [vmem:[#allocation5 + $0x350] sm:$0xf] }
  0x4a   :  { %978 = vmatpush.bf16.msrb.mxu1 %v2548_v31  ;;  %1006 = vmatpush.bf16.msrb.mxu3 %v2552_v36  ;;  %v3276_v2 = vld [vmem:[#allocation5 + $0x20c] sm:$0xf]  ;;  %v2452_v11 = vor.u32 %v3280_v61, %v2451_v60  ;;  %v2200_v12 = vor.u32 %v3212_v62, %v2197_v1  ;;  %v2363_v31 = vld [vmem:[#allocation5 + $0x150] sm:$0xf]  ;;  %v3253_v36 = vld [vmem:[#allocation5 + $0x154] sm:$0xf] }
  0x4b   :  { %v2453_v3 = vld [vmem:[#allocation5 + $0x228] sm:$0xf0]  ;;  %v3321_v35 = vld [vmem:[#allocation5 + $0x36c] sm:$0xf0]  ;;  %v2365_v37 = vld [vmem:[#allocation5 + $0x170] sm:$0xf0]  ;;  %v2364_v40 = vor.u32 %v3257_v32, %v2363_v31 }
  0x4c   :  { %965 = vmatpush.bf16.msrb.mxu0 %v2260_v42  ;;  %993 = vmatpush.bf16.msrb.mxu2 %v2264_v44  ;;  %v2456_v15 = vor.u32 %v3276_v2, %v2453_v3  ;;  %v3317_v38 = vld [vmem:[#allocation5 + $0x354] sm:$0xf]  ;;  %v2620_v41 = vor.u32 %v3321_v35, %v2619_v33  ;;  %v2368_v42 = vor.u32 %v3253_v36, %v2365_v37  ;;  %v3249_v44 = vld [vmem:[#allocation5 + $0x12c] sm:$0xf0] }
  0x4d   :  { %v2621_v39 = vld [vmem:[#allocation5 + $0x370] sm:$0xf0]  ;;  %v2587_v45 = vld [vmem:[#allocation5 + $0x310] sm:$0xf] }
  0x4e   :  { %979 = vmatpush.bf16.msrb.mxu1 %v2516_v43  ;;  %1007 = vmatpush.bf16.msrb.mxu3 %v2520_v48  ;;  %v2331_v43 = vld [vmem:[#allocation5 + $0x110] sm:$0xf]  ;;  %v2624_v46 = vor.u32 %v3317_v38, %v2621_v39  ;;  %v3245_v48 = vld [vmem:[#allocation5 + $0x114] sm:$0xf]  ;;  %v2435_v38 = vld [vmem:[#allocation5 + $0x1d8] sm:$0xf] }
  0x4f   :  { %v3313_v47 = vld [vmem:[#allocation5 + $0x32c] sm:$0xf0]  ;;  %v2333_v49 = vld [vmem:[#allocation5 + $0x130] sm:$0xf0]  ;;  %v2332_v53 = vor.u32 %v3249_v44, %v2331_v43  ;;  %v3274_v39 = vld [vmem:[#allocation5 + $0x1f4] sm:$0xf0] }
  0x50   :  { %966 = vmatpush.bf16.msrb.mxu0 %v2228_v55  ;;  %994 = vmatpush.bf16.msrb.mxu2 %v2232_v59  ;;  %v3309_v50 = vld [vmem:[#allocation5 + $0x314] sm:$0xf]  ;;  %v2588_v54 = vor.u32 %v3313_v47, %v2587_v45  ;;  %v2336_v55 = vor.u32 %v3245_v48, %v2333_v49  ;;  %v2299_v56 = vld [vmem:[#allocation5 + $0xd0] sm:$0xf]  ;;  %v3270_v43 = vld [vmem:[#allocation5 + $0x1dc] sm:$0xf] }
  0x51   :  { %v2589_v51 = vld [vmem:[#allocation5 + $0x330] sm:$0xf0]  ;;  %v3241_v57 = vld [vmem:[#allocation5 + $0xec] sm:$0xf0]  ;;  %v2437_v44 = vld [vmem:[#allocation5 + $0x1f8] sm:$0xf0] }
  0x52   :  { %980 = vmatpush.bf16.msrb.mxu1 %v2484_v58  ;;  %1008 = vmatpush.bf16.msrb.mxu3 %v2488_v0  ;;  %v2555_v58 = vld [vmem:[#allocation5 + $0x2d0] sm:$0xf]  ;;  %v2592_v59 = vor.u32 %v3309_v50, %v2589_v51  ;;  %v3237_v61 = vld [vmem:[#allocation5 + $0xd4] sm:$0xf]  ;;  %v2300_v2 = vor.u32 %v3241_v57, %v2299_v56  ;;  %v3334_v47 = vld [vmem:[#allocation5 + $0x3dc] sm:$0xf]  ;;  %v2436_v50 = vor.u32 %v3274_v39, %v2435_v38 }
  0x53   :  { %v3305_v60 = vld [vmem:[#allocation5 + $0x2ec] sm:$0xf0]  ;;  %v2301_v62 = vld [vmem:[#allocation5 + $0xf0] sm:$0xf0]  ;;  %v2693_v48 = vld [vmem:[#allocation5 + $0x3f8] sm:$0xf0] }
  0x54   :  { %967 = vmatpush.bf16.msrb.mxu0 %v2196_v7  ;;  %995 = vmatpush.bf16.msrb.mxu2 %v2200_v12  ;;  %v3301_v0 = vld [vmem:[#allocation5 + $0x2d4] sm:$0xf]  ;;  %v2556_v3 = vor.u32 %v3305_v60, %v2555_v58  ;;  %v2304_v4 = vor.u32 %v3237_v61, %v2301_v62  ;;  %v2267_v5 = vld [vmem:[#allocation5 + $0x90] sm:$0xf]  ;;  %v2659_v56 = vld [vmem:[#allocation5 + $0x398] sm:$0xf]  ;;  %v2696_v57 = vor.u32 %v3334_v47, %v2693_v48 }
  0x55   :  { %v2557_v1 = vld [vmem:[#allocation5 + $0x2f0] sm:$0xf0]  ;;  %v3233_v6 = vld [vmem:[#allocation5 + $0xac] sm:$0xf0]  ;;  %v3330_v58 = vld [vmem:[#allocation5 + $0x3b4] sm:$0xf0] }
  0x56   :  { %981 = vmatpush.bf16.msrb.mxu1 %v2452_v11  ;;  %1009 = vmatpush.bf16.msrb.mxu3 %v2456_v15  ;;  %v2523_v7 = vld [vmem:[#allocation5 + $0x290] sm:$0xf]  ;;  %v2560_v8 = vor.u32 %v3301_v0, %v2557_v1  ;;  %v3229_v10 = vld [vmem:[#allocation5 + $0x94] sm:$0xf]  ;;  %v2268_v14 = vor.u32 %v3233_v6, %v2267_v5  ;;  %v2405_v60 = vld [vmem:[#allocation5 + $0x1b8] sm:$0xf0]  ;;  %v2660_v1 = vor.u32 %v3330_v58, %v2659_v56 }
  0x57   :  { %968 = vmatmul.bf16.vlgmr.msrb.gmra.mxu0 %v3659_v52  ;;  %996 = vmatmul.bf16.vlgmr.msrb.gmra.mxu2 %v3659_v52  ;;  %v3297_v9 = vld [vmem:[#allocation5 + $0x2ac] sm:$0xf0]  ;;  %v2269_v11 = vld [vmem:[#allocation5 + $0xb0] sm:$0xf0]  ;;  %v3326_v61 = vld [vmem:[#allocation5 + $0x39c] sm:$0xf] }
  0x58   :  { %1016 = vmatpush.bf16.msra.mxu0 %v2428_v16  ;;  %1044 = vmatpush.bf16.msra.mxu2 %v2432_v18  ;;  %v3293_v12 = vld [vmem:[#allocation5 + $0x294] sm:$0xf]  ;;  %v2524_v15 = vor.u32 %v3297_v9, %v2523_v7  ;;  %v2272_v16 = vor.u32 %v3229_v10, %v2269_v11  ;;  %v3225_v18 = vld [vmem:[#allocation5 + $0x6c] sm:$0xf0]  ;;  %v2661_v62 = vld [vmem:[#allocation5 + $0x3b8] sm:$0xf0] }
  0x59   :  { %982 = vmatmul.bf16.vlgmr.msrb.gmra.mxu1 %v3661_v63  ;;  %1010 = vmatmul.bf16.vlgmr.msrb.gmra.mxu3 %v3661_v63  ;;  %v2525_v13 = vld [vmem:[#allocation5 + $0x2b0] sm:$0xf0]  ;;  %v2491_v19 = vld [vmem:[#allocation5 + $0x250] sm:$0xf]  ;;  %v2627_v5 = vld [vmem:[#allocation5 + $0x358] sm:$0xf]  ;;  %v2664_v6 = vor.u32 %v3326_v61, %v2661_v62 }
  0x5a   :  { %1030 = vmatpush.bf16.msra.mxu1 %v2684_v17  ;;  %1058 = vmatpush.bf16.msra.mxu3 %v2688_v22  ;;  %v2235_v17 = vld [vmem:[#allocation5 + $0x50] sm:$0xf]  ;;  %v2528_v20 = vor.u32 %v3293_v12, %v2525_v13  ;;  %v3221_v22 = vld [vmem:[#allocation5 + $0x54] sm:$0xf]  ;;  %v3322_v7 = vld [vmem:[#allocation5 + $0x374] sm:$0xf0] }
  0x5b   :  { %v3289_v21 = vld [vmem:[#allocation5 + $0x26c] sm:$0xf0]  ;;  %v2237_v23 = vld [vmem:[#allocation5 + $0x70] sm:$0xf0]  ;;  %v2236_v26 = vor.u32 %v3225_v18, %v2235_v17  ;;  %v2373_v9 = vld [vmem:[#allocation5 + $0x178] sm:$0xf0]  ;;  %v2628_v13 = vor.u32 %v3322_v7, %v2627_v5 }
  0x5c   :  { %1017 = vmatpush.bf16.msra.mxu0 %v2396_v28  ;;  %1045 = vmatpush.bf16.msra.mxu2 %v2400_v30  ;;  %v3285_v24 = vld [vmem:[#allocation5 + $0x254] sm:$0xf]  ;;  %v2203_v27 = vld [vmem:[#allocation5 + $0x10] sm:$0xf]  ;;  %v2240_v30 = vor.u32 %v3221_v22, %v2237_v23  ;;  %v3318_v10 = vld [vmem:[#allocation5 + $0x35c] sm:$0xf] }
  0x5d   :  { %v2493_v25 = vld [vmem:[#allocation5 + $0x270] sm:$0xf0]  ;;  %v3217_v28 = vld [vmem:[#allocation5 + $0x2c] sm:$0xf0]  ;;  %v2629_v11 = vld [vmem:[#allocation5 + $0x378] sm:$0xf0] }
  0x5e   :  { %1031 = vmatpush.bf16.msra.mxu1 %v2652_v29  ;;  %1059 = vmatpush.bf16.msra.mxu3 %v2656_v34  ;;  %v2492_v29 = vor.u32 %v3289_v21, %v2491_v19  ;;  %v2459_v31 = vld [vmem:[#allocation5 + $0x210] sm:$0xf]  ;;  %v3213_v33 = vld [vmem:[#allocation5 + $0x14] sm:$0xf]  ;;  %v2496_v34 = vor.u32 %v3285_v24, %v2493_v25  ;;  %v2595_v17 = vld [vmem:[#allocation5 + $0x318] sm:$0xf]  ;;  %v2632_v18 = vor.u32 %v3318_v10, %v2629_v11 }
  0x5f   :  { %v3281_v32 = vld [vmem:[#allocation5 + $0x22c] sm:$0xf0]  ;;  %v2205_v35 = vld [vmem:[#allocation5 + $0x30] sm:$0xf0]  ;;  %v3314_v19 = vld [vmem:[#allocation5 + $0x334] sm:$0xf0] }
  0x60   :  { %1018 = vmatpush.bf16.msra.mxu0 %v2364_v40  ;;  %1046 = vmatpush.bf16.msra.mxu2 %v2368_v42  ;;  %v3277_v36 = vld [vmem:[#allocation5 + $0x214] sm:$0xf]  ;;  %v2691_v40 = vld [vmem:[#allocation5 + $0x3d8] sm:$0xf]  ;;  %v2460_v45 = vor.u32 %v3281_v32, %v2459_v31  ;;  %v2341_v21 = vld [vmem:[#allocation5 + $0x138] sm:$0xf0]  ;;  %v2596_v25 = vor.u32 %v3314_v19, %v2595_v17 }
  0x61   :  { %v2461_v37 = vld [vmem:[#allocation5 + $0x230] sm:$0xf0]  ;;  %v3338_v42 = vld [vmem:[#allocation5 + $0x3f4] sm:$0xf0]  ;;  %v3310_v22 = vld [vmem:[#allocation5 + $0x31c] sm:$0xf] }
  0x62   :  { %1032 = vmatpush.bf16.msra.mxu1 %v2620_v41  ;;  %1060 = vmatpush.bf16.msra.mxu3 %v2624_v46  ;;  %v2204_v41 = vor.u32 %v3217_v28, %v2203_v27  ;;  %v2208_v46 = vor.u32 %v3213_v33, %v2205_v35  ;;  %v2464_v49 = vor.u32 %v3277_v36, %v2461_v37  ;;  %v2597_v23 = vld [vmem:[#allocation5 + $0x338] sm:$0xf0]  ;;  %v2307_v27 = vld [vmem:[#allocation5 + $0xd8] sm:$0xf]  ;;  %v3354_v11 = vld [vmem:[#allocation8 + $0x74] sm:$0xf0] }
  0x63   :  { %v2692_v51 = vor.u32 %v3338_v42, %v2691_v40  ;;  %v3242_v28 = vld [vmem:[#allocation5 + $0xf4] sm:$0xf0]  ;;  %v3238_v32 = vld [vmem:[#allocation5 + $0xdc] sm:$0xf]  ;;  %v2747_v19 = vld [vmem:[#allocation8 + $0x60] sm:$0xf] }
  0x64   :  { %1019 = vmatpush.bf16.msra.mxu0 %v2332_v53  ;;  %1047 = vmatpush.bf16.msra.mxu2 %v2336_v55  ;;  %v2440_v53 = vor.u32 %v3270_v43, %v2437_v44  ;;  %v3266_v55 = vld [vmem:[#allocation5 + $0x1b4] sm:$0xf0]  ;;  %v2309_v33 = vld [vmem:[#allocation5 + $0xf8] sm:$0xf0]  ;;  %v2308_v36 = vor.u32 %v3242_v28, %v2307_v27 }
  0x65   :  { %v3306_v31 = vld [vmem:[#allocation5 + $0x2f4] sm:$0xf0]  ;;  %v2565_v35 = vld [vmem:[#allocation5 + $0x2f8] sm:$0xf0]  ;;  %v2312_v38 = vor.u32 %v3238_v32, %v2309_v33  ;;  %v3348_v32 = vld [vmem:[#allocation8 + $0x44] sm:$0xf0] }
  0x66   :  { %1033 = vmatpush.bf16.msra.mxu1 %v2588_v54  ;;  %1061 = vmatpush.bf16.msra.mxu3 %v2592_v59  ;;  %v2403_v54 = vld [vmem:[#allocation5 + $0x198] sm:$0xf]  ;;  %v3262_v59 = vld [vmem:[#allocation5 + $0x19c] sm:$0xf] }
  0x67   :  { %v2404_v0 = vor.u32 %v3266_v55, %v2403_v54  ;;  %v2275_v39 = vld [vmem:[#allocation5 + $0x98] sm:$0xf]  ;;  %v3230_v44 = vld [vmem:[#allocation5 + $0x9c] sm:$0xf] }
  0x68   :  { %1020 = vmatpush.bf16.msra.mxu0 %v2300_v2  ;;  %1048 = vmatpush.bf16.msra.mxu2 %v2304_v4  ;;  %v2408_v2 = vor.u32 %v3262_v59, %v2405_v60  ;;  %v3258_v4 = vld [vmem:[#allocation5 + $0x174] sm:$0xf0]  ;;  %v2533_v47 = vld [vmem:[#allocation5 + $0x2b8] sm:$0xf0] }
  0x69   :  { %v3234_v40 = vld [vmem:[#allocation5 + $0xb4] sm:$0xf0]  ;;  %v2245_v58 = vld [vmem:[#allocation5 + $0x78] sm:$0xf0] }
  0x6a   :  { %1034 = vmatpush.bf16.msra.mxu1 %v2556_v3  ;;  %1062 = vmatpush.bf16.msra.mxu3 %v2560_v8  ;;  %v2371_v3 = vld [vmem:[#allocation5 + $0x158] sm:$0xf]  ;;  %v3254_v8 = vld [vmem:[#allocation5 + $0x15c] sm:$0xf]  ;;  %v2276_v48 = vor.u32 %v3234_v40, %v2275_v39 }
  0x6b   :  { %v2372_v12 = vor.u32 %v3258_v4, %v2371_v3  ;;  %v3298_v43 = vld [vmem:[#allocation5 + $0x2b4] sm:$0xf0]  ;;  %v3286_v59 = vld [vmem:[#allocation5 + $0x25c] sm:$0xf] }
  0x6c   :  { %1021 = vmatpush.bf16.msra.mxu0 %v2268_v14  ;;  %1049 = vmatpush.bf16.msra.mxu2 %v2272_v16  ;;  %v2376_v14 = vor.u32 %v3254_v8, %v2373_v9  ;;  %v3250_v16 = vld [vmem:[#allocation5 + $0x134] sm:$0xf0]  ;;  %v2501_v60 = vld [vmem:[#allocation5 + $0x278] sm:$0xf0] }
  0x6d   :  { %v2499_v54 = vld [vmem:[#allocation5 + $0x258] sm:$0xf]  ;;  %v2504_v5 = vor.u32 %v3286_v59, %v2501_v60  ;;  %v2213_v7 = vld [vmem:[#allocation5 + $0x38] sm:$0xf0]  ;;  %v3402_v60 = vld [vmem:[#allocation8 + $0x1f4] sm:$0xf0] }
  0x6e   :  { %1035 = vmatpush.bf16.msra.mxu1 %v2524_v15  ;;  %1063 = vmatpush.bf16.msra.mxu3 %v2528_v20  ;;  %v2339_v15 = vld [vmem:[#allocation5 + $0x118] sm:$0xf]  ;;  %v3246_v20 = vld [vmem:[#allocation5 + $0x11c] sm:$0xf] }
  0x6f   :  { %v2340_v24 = vor.u32 %v3250_v16, %v2339_v15  ;;  %v3290_v56 = vld [vmem:[#allocation5 + $0x274] sm:$0xf0]  ;;  %v3278_v8 = vld [vmem:[#allocation5 + $0x21c] sm:$0xf] }
  0x70   :  { %1022 = vmatpush.bf16.msra.mxu0 %v2236_v26  ;;  %1050 = vmatpush.bf16.msra.mxu2 %v2240_v30  ;;  %v2344_v26 = vor.u32 %v3246_v20, %v2341_v21  ;;  %v2600_v30 = vor.u32 %v3310_v22, %v2597_v23  ;;  %v2211_v62 = vld [vmem:[#allocation5 + $0x18] sm:$0xf]  ;;  %v2469_v9 = vld [vmem:[#allocation5 + $0x238] sm:$0xf0]  ;;  %v3352_v20 = vld [vmem:[#allocation8 + $0x64] sm:$0xf0] }
  0x71   :  { %v2467_v3 = vld [vmem:[#allocation5 + $0x218] sm:$0xf]  ;;  %v2472_v17 = vor.u32 %v3278_v8, %v2469_v9  ;;  %v2811_v22 = vld [vmem:[#allocation8 + $0xe0] sm:$0xf]  ;;  %v3368_v23 = vld [vmem:[#allocation8 + $0xe4] sm:$0xf0] }
  0x72   :  { %1036 = vmatpush.bf16.msra.mxu1 %v2492_v29  ;;  %1064 = vmatpush.bf16.msra.mxu3 %v2496_v34  ;;  %v2563_v29 = vld [vmem:[#allocation5 + $0x2d8] sm:$0xf]  ;;  %v3302_v34 = vld [vmem:[#allocation5 + $0x2dc] sm:$0xf]  ;;  %v2812_v27 = vor.u32 %v3368_v23, %v2811_v22  ;;  %v3382_v8 = vld [vmem:[#allocation8 + $0x154] sm:$0xf0] }
  0x73   :  { %v2564_v37 = vor.u32 %v3306_v31, %v2563_v29  ;;  %v2568_v42 = vor.u32 %v3302_v34, %v2565_v35  ;;  %v3282_v4 = vld [vmem:[#allocation5 + $0x234] sm:$0xf0]  ;;  %v3366_v29 = vld [vmem:[#allocation8 + $0xd4] sm:$0xf0]  ;;  %v2731_v31 = vld [vmem:[#allocation8 + $0x40] sm:$0xf] }
  0x74   :  { %1023 = vmatpush.bf16.msra.mxu0 %v2204_v41  ;;  %1051 = vmatpush.bf16.msra.mxu2 %v2208_v46  ;;  %v2531_v41 = vld [vmem:[#allocation5 + $0x298] sm:$0xf]  ;;  %v3294_v46 = vld [vmem:[#allocation5 + $0x29c] sm:$0xf]  ;;  %v2468_v15 = vor.u32 %v3282_v4, %v2467_v3  ;;  %v2795_v34 = vld [vmem:[#allocation8 + $0xc0] sm:$0xf] }
  0x75   :  { %v2536_v55 = vor.u32 %v3294_v46, %v2533_v47  ;;  %v2755_v10 = vld [vmem:[#allocation8 + $0x70] sm:$0xf]  ;;  %v3364_v35 = vld [vmem:[#allocation8 + $0xc4] sm:$0xf0]  ;;  %v2779_v46 = vld [vmem:[#allocation8 + $0xa0] sm:$0xf] }
  0x76   :  { %1037 = vmatpush.bf16.msra.mxu1 %v2460_v45  ;;  %1065 = vmatpush.bf16.msra.mxu3 %v2464_v49  ;;  %v2277_v45 = vld [vmem:[#allocation5 + $0xb8] sm:$0xf0]  ;;  %v2532_v49 = vor.u32 %v3298_v43, %v2531_v41  ;;  %v2803_v28 = vld [vmem:[#allocation8 + $0xd0] sm:$0xf]  ;;  %v2796_v39 = vor.u32 %v3364_v35, %v2795_v34  ;;  %v3344_v43 = vld [vmem:[#allocation8 + $0x24] sm:$0xf0] }
  0x77   :  { %1024 = vmatmul.bf16.vlgmr.msra.gmra.mxu0 %v3659_v52  ;;  %1052 = vmatmul.bf16.vlgmr.msra.gmra.mxu2 %v3659_v52  ;;  %v2804_v33 = vor.u32 %v3366_v29, %v2803_v28  ;;  %v2787_v40 = vld [vmem:[#allocation8 + $0xb0] sm:$0xf]  ;;  %v3360_v47 = vld [vmem:[#allocation8 + $0xa4] sm:$0xf0]  ;;  %v3418_v3 = vld [vmem:[#allocation8 + $0x274] sm:$0xf0] }
  0x78   :  { %1072 = vmatpush.bf16.msrb.mxu0 %v2436_v50  ;;  %1100 = vmatpush.bf16.msrb.mxu2 %v2440_v53  ;;  %v2280_v50 = vor.u32 %v3230_v44, %v2277_v45  ;;  %v3226_v53 = vld [vmem:[#allocation5 + $0x74] sm:$0xf0]  ;;  %v3386_v45 = vld [vmem:[#allocation8 + $0x174] sm:$0xf0]  ;;  %v3380_v22 = vld [vmem:[#allocation8 + $0x144] sm:$0xf0] }
  0x79   :  { %1038 = vmatmul.bf16.vlgmr.msra.gmra.mxu1 %v3661_v63  ;;  %1066 = vmatmul.bf16.vlgmr.msra.gmra.mxu3 %v3661_v63  ;;  %v3414_v28 = vld [vmem:[#allocation8 + $0x254] sm:$0xf0]  ;;  %v2987_v35 = vld [vmem:[#allocation8 + $0x240] sm:$0xf] }
  0x7a   :  { %1086 = vmatpush.bf16.msrb.mxu1 %v2692_v51  ;;  %1114 = vmatpush.bf16.msrb.mxu3 %v2696_v57  ;;  %v2243_v51 = vld [vmem:[#allocation5 + $0x58] sm:$0xf]  ;;  %v3222_v57 = vld [vmem:[#allocation5 + $0x5c] sm:$0xf] }
  0x7b   :  { %v2244_v61 = vor.u32 %v3226_v53, %v2243_v51  ;;  %v3342_v51 = vld [vmem:[#allocation8 + $0x14] sm:$0xf0]  ;;  %v2780_v53 = vor.u32 %v3360_v47, %v2779_v46  ;;  %v3396_v46 = vld [vmem:[#allocation8 + $0x1c4] sm:$0xf0] }
  0x7c   :  { %1073 = vmatpush.bf16.msrb.mxu0 %v2404_v0  ;;  %1101 = vmatpush.bf16.msrb.mxu2 %v2408_v2  ;;  %v2500_v0 = vor.u32 %v3290_v56, %v2499_v54  ;;  %v3218_v2 = vld [vmem:[#allocation5 + $0x34] sm:$0xf0]  ;;  %v2875_v56 = vld [vmem:[#allocation8 + $0x160] sm:$0xf] }
  0x7d   :  { %v2771_v54 = vld [vmem:[#allocation8 + $0x90] sm:$0xf] }
  0x7e   :  { %1087 = vmatpush.bf16.msrb.mxu1 %v2660_v1  ;;  %1115 = vmatpush.bf16.msrb.mxu3 %v2664_v6  ;;  %v2248_v1 = vor.u32 %v3222_v57, %v2245_v58  ;;  %v3214_v6 = vld [vmem:[#allocation5 + $0x1c] sm:$0xf]  ;;  %v3384_v57 = vld [vmem:[#allocation8 + $0x164] sm:$0xf0]  ;;  %v2947_v58 = vld [vmem:[#allocation8 + $0x1f0] sm:$0xf] }
  0x7f   :  { %v2216_v16 = vor.u32 %v3214_v6, %v2213_v7  ;;  %v2876_v59 = vor.u32 %v3384_v57, %v2875_v56  ;;  %v2763_v6 = vld [vmem:[#allocation8 + $0x80] sm:$0xf]  ;;  %v3356_v7 = vld [vmem:[#allocation8 + $0x84] sm:$0xf0] }
  0x80   :  { %1074 = vmatpush.bf16.msrb.mxu0 %v2372_v12  ;;  %1102 = vmatpush.bf16.msrb.mxu2 %v2376_v14  ;;  %v2212_v12 = vor.u32 %v3218_v2, %v2211_v62  ;;  %v3370_v14 = vld [vmem:[#allocation8 + $0xf4] sm:$0xf0]  ;;  %v2699_v62 = vld [vmem:[#allocation8] sm:$0xf]  ;;  %v3011_v2 = vld [vmem:[#allocation8 + $0x270] sm:$0xf] }
  0x81   :  { %v3051_v57 = vld [vmem:[#allocation8 + $0x2c0] sm:$0xf] }
  0x82   :  { %1088 = vmatpush.bf16.msrb.mxu1 %v2628_v13  ;;  %1116 = vmatpush.bf16.msrb.mxu3 %v2632_v18  ;;  %v2819_v13 = vld [vmem:[#allocation8 + $0xf0] sm:$0xf]  ;;  %v2756_v18 = vor.u32 %v3354_v11, %v2755_v10  ;;  %v3434_v11 = vld [vmem:[#allocation8 + $0x2f4] sm:$0xf0] }
  0x83   :  { %v2820_v21 = vor.u32 %v3370_v14, %v2819_v13  ;;  %v3075_v10 = vld [vmem:[#allocation8 + $0x2f0] sm:$0xf]  ;;  %v3012_v13 = vor.u32 %v3418_v3, %v3011_v2  ;;  %v3003_v14 = vld [vmem:[#allocation8 + $0x260] sm:$0xf] }
  0x84   :  { %1075 = vmatpush.bf16.msrb.mxu0 %v2340_v24  ;;  %1103 = vmatpush.bf16.msrb.mxu2 %v2344_v26  ;;  %v2748_v24 = vor.u32 %v3352_v20, %v2747_v19  ;;  %v3350_v26 = vld [vmem:[#allocation8 + $0x54] sm:$0xf0]  ;;  %v3400_v19 = vld [vmem:[#allocation8 + $0x1e4] sm:$0xf0]  ;;  %v2971_v3 = vld [vmem:[#allocation8 + $0x220] sm:$0xf] }
  0x86   :  { %1089 = vmatpush.bf16.msrb.mxu1 %v2596_v25  ;;  %1117 = vmatpush.bf16.msrb.mxu3 %v2600_v30  ;;  %v2739_v25 = vld [vmem:[#allocation8 + $0x50] sm:$0xf] }
  0x87   :  { %v2740_v30 = vor.u32 %v3350_v26, %v2739_v25  ;;  %v3432_v25 = vld [vmem:[#allocation8 + $0x2e4] sm:$0xf0] }
  0x88   :  { %1076 = vmatpush.bf16.msrb.mxu0 %v2308_v36  ;;  %1104 = vmatpush.bf16.msrb.mxu2 %v2312_v38  ;;  %v2732_v36 = vor.u32 %v3348_v32, %v2731_v31  ;;  %v3346_v38 = vld [vmem:[#allocation8 + $0x34] sm:$0xf0]  ;;  %v2931_v32 = vld [vmem:[#allocation8 + $0x1d0] sm:$0xf] }
  0x89   :  { %v3679_v31 = vld [vmem:[#allocation7] sm:$0xff] }
  0x8a   :  { %1090 = vmatpush.bf16.msrb.mxu1 %v2564_v37  ;;  %1118 = vmatpush.bf16.msrb.mxu3 %v2568_v42  ;;  %v2723_v37 = vld [vmem:[#allocation8 + $0x30] sm:$0xf]  ;;  %v239_v47 = vperm.slane %v3679_v31, 1 }
  0x8b   :  { %v2724_v41 = vor.u32 %v3346_v38, %v2723_v37  ;;  %v2883_v42 = vld [vmem:[#allocation8 + $0x170] sm:$0xf]  ;;  %v238_v37 = vperm.slane %v3679_v31, 0 }
  0x8c   :  { %1077 = vmatpush.bf16.msrb.mxu0 %v2276_v48  ;;  %1105 = vmatpush.bf16.msrb.mxu2 %v2280_v50  ;;  %v2884_v48 = vor.u32 %v3386_v45, %v2883_v42  ;;  %v2707_v50 = vld [vmem:[#allocation8 + $0x10] sm:$0xf]  ;;  %v2923_v45 = vld [vmem:[#allocation8 + $0x1c0] sm:$0xf] }
  0x8d   :  { %v3059_v42 = vld [vmem:[#allocation8 + $0x2d0] sm:$0xf] }
  0x8e   :  { %1091 = vmatpush.bf16.msrb.mxu1 %v2532_v49  ;;  %1119 = vmatpush.bf16.msrb.mxu3 %v2536_v55  ;;  %v3358_v55 = vld [vmem:[#allocation8 + $0x94] sm:$0xf0] }
  0x8f   :  { %v2772_v4 = vor.u32 %v3358_v55, %v2771_v54  ;;  %v2843_v54 = vld [vmem:[#allocation8 + $0x120] sm:$0xf]  ;;  %v3376_v55 = vld [vmem:[#allocation8 + $0x124] sm:$0xf0] }
  0x90   :  { %1078 = vmatpush.bf16.msrb.mxu0 %v2244_v61  ;;  %1106 = vmatpush.bf16.msrb.mxu2 %v2248_v1  ;;  %v2708_v61 = vor.u32 %v3342_v51, %v2707_v50  ;;  %v2948_v1 = vor.u32 %v3402_v60, %v2947_v58  ;;  %v3410_v50 = vld [vmem:[#allocation8 + $0x234] sm:$0xf0]  ;;  %v2844_v56 = vor.u32 %v3376_v55, %v2843_v54  ;;  %v3428_v58 = vld [vmem:[#allocation8 + $0x2c4] sm:$0xf0] }
  0x91   :  { %v3052_v60 = vor.u32 %v3428_v58, %v3051_v57  ;;  %v3388_v54 = vld [vmem:[#allocation8 + $0x184] sm:$0xf0]  ;;  %v3131_v57 = vld [vmem:[#allocation8 + $0x360] sm:$0xf] }
  0x92   :  { %1092 = vmatpush.bf16.msrb.mxu1 %v2500_v0  ;;  %1120 = vmatpush.bf16.msrb.mxu3 %v2504_v5  ;;  %v3340_v0 = vld [vmem:[#allocation8 + $0x4] sm:$0xf0]  ;;  %v2867_v5 = vld [vmem:[#allocation8 + $0x150] sm:$0xf] }
  0x93   :  { %v2868_v9 = vor.u32 %v3382_v8, %v2867_v5  ;;  %v3374_v8 = vld [vmem:[#allocation8 + $0x114] sm:$0xf0]  ;;  %v3448_v58 = vld [vmem:[#allocation8 + $0x364] sm:$0xf0] }
  0x94   :  { %1079 = vmatpush.bf16.msrb.mxu0 %v2212_v12  ;;  %1107 = vmatpush.bf16.msrb.mxu2 %v2216_v16  ;;  %v2700_v12 = vor.u32 %v3340_v0, %v2699_v62  ;;  %v3416_v16 = vld [vmem:[#allocation8 + $0x264] sm:$0xf0]  ;;  %v3394_v62 = vld [vmem:[#allocation8 + $0x1b4] sm:$0xf0] }
  0x95   :  { %v3004_v26 = vor.u32 %v3416_v16, %v3003_v14  ;;  %v3392_v16 = vld [vmem:[#allocation8 + $0x1a4] sm:$0xf0] }
  0x96   :  { %1093 = vmatpush.bf16.msrb.mxu1 %v2468_v15  ;;  %1121 = vmatpush.bf16.msrb.mxu3 %v2472_v17  ;;  %v2764_v15 = vor.u32 %v3356_v7, %v2763_v6  ;;  %v3076_v17 = vor.u32 %v3434_v11, %v3075_v10  ;;  %v2835_v7 = vld [vmem:[#allocation8 + $0x110] sm:$0xf] }
  0x97   :  { %1080 = vmatmul.bf16.vlgmr.msrb.gmra.mxu0 %v3659_v52  ;;  %1108 = vmatmul.bf16.vlgmr.msrb.gmra.mxu2 %v3659_v52  ;;  %v3362_v52 = vld [vmem:[#allocation8 + $0xb4] sm:$0xf0]  ;;  %v2836_v10 = vor.u32 %v3374_v8, %v2835_v7  ;;  %v3043_v11 = vld [vmem:[#allocation8 + $0x2b0] sm:$0xf]  ;;  %v2821_v8 = vld [vmem:[#allocation8 + $0xf8] sm:$0xf0] }
  0x98   :  { %1924 = vmatpush.bf16.msra.mxu0 %v2756_v18  ;;  %v2788_v44 = vor.u32 %v3362_v52, %v2787_v40  ;;  %1952 = vmatpush.bf16.msra.mxu2 %v2884_v48  ;;  %v2939_v18 = vld [vmem:[#allocation8 + $0x1e0] sm:$0xf]  ;;  %v3378_v40 = vld [vmem:[#allocation8 + $0x134] sm:$0xf0]  ;;  %v2924_v48 = vor.u32 %v3396_v46, %v2923_v45 }
  0x99   :  { %1094 = vmatmul.bf16.vlgmr.msrb.gmra.mxu1 %v3661_v63  ;;  %1122 = vmatmul.bf16.vlgmr.msrb.gmra.mxu3 %v3661_v63  ;;  %v2715_v63 = vld [vmem:[#allocation8 + $0x20] sm:$0xf]  ;;  %v2940_v20 = vor.u32 %v3400_v19, %v2939_v18 }
  0x9a   :  { %1938 = vmatpush.bf16.msra.mxu1 %v2820_v21  ;;  %v2716_v49 = vor.u32 %v3344_v43, %v2715_v63  ;;  %1966 = vmatpush.bf16.msra.mxu3 %v2948_v1  ;;  %v2859_v21 = vld [vmem:[#allocation8 + $0x140] sm:$0xf]  ;;  %v3430_v63 = vld [vmem:[#allocation8 + $0x2d4] sm:$0xf0] }
  0x9b   :  { %v2860_v23 = vor.u32 %v3380_v22, %v2859_v21  ;;  %v3406_v21 = vld [vmem:[#allocation8 + $0x214] sm:$0xf0] }
  0x9c   :  { %1925 = vmatpush.bf16.msra.mxu0 %v2748_v24  ;;  %1953 = vmatpush.bf16.msra.mxu2 %v2876_v59  ;;  %v3067_v24 = vld [vmem:[#allocation8 + $0x2e0] sm:$0xf] }
  0x9d   :  { %v3068_v29 = vor.u32 %v3432_v25, %v3067_v24  ;;  %v2827_v25 = vld [vmem:[#allocation8 + $0x100] sm:$0xf] }
  0x9e   :  { %1939 = vmatpush.bf16.msra.mxu1 %v2812_v27  ;;  %1967 = vmatpush.bf16.msra.mxu3 %v2940_v20  ;;  %v2995_v27 = vld [vmem:[#allocation8 + $0x250] sm:$0xf] }
  0x9f   :  { %v2963_v20 = vld [vmem:[#allocation8 + $0x210] sm:$0xf] }
  0xa0   :  { %1926 = vmatpush.bf16.msra.mxu0 %v2740_v30  ;;  %1954 = vmatpush.bf16.msra.mxu2 %v2868_v9  ;;  %v2996_v30 = vor.u32 %v3414_v28, %v2995_v27  ;;  %v2964_v24 = vor.u32 %v3406_v21, %v2963_v20  ;;  %v3035_v28 = vld [vmem:[#allocation8 + $0x2a0] sm:$0xf] }
  0xa2   :  { %1940 = vmatpush.bf16.msra.mxu1 %v2804_v33  ;;  %v3398_v33 = vld [vmem:[#allocation8 + $0x1d4] sm:$0xf0] }
  0xa3   :  { %v2932_v34 = vor.u32 %v3398_v33, %v2931_v32 }
  0xa4   :  { %1927 = vmatpush.bf16.msra.mxu0 %v2732_v36  ;;  %1955 = vmatpush.bf16.msra.mxu2 %v2860_v23  ;;  %v3412_v36 = vld [vmem:[#allocation8 + $0x244] sm:$0xf0] }
  0xa5   :  { %v2988_v38 = vor.u32 %v3412_v36, %v2987_v35  ;;  %1968 = vmatpush.bf16.msra.mxu3 %v2932_v34  ;;  %v2899_v34 = vld [vmem:[#allocation8 + $0x190] sm:$0xf]  ;;  %v3390_v35 = vld [vmem:[#allocation8 + $0x194] sm:$0xf0] }
  0xa6   :  { %1941 = vmatpush.bf16.msra.mxu1 %v2796_v39  ;;  %v2851_v39 = vld [vmem:[#allocation8 + $0x130] sm:$0xf] }
  0xa8   :  { %1928 = vmatpush.bf16.msra.mxu0 %v2724_v41  ;;  %v2852_v41 = vor.u32 %v3378_v40, %v2851_v39  ;;  %v2900_v39 = vor.u32 %v3390_v35, %v2899_v34  ;;  %v2955_v40 = vld [vmem:[#allocation8 + $0x200] sm:$0xf] }
  0xa9   :  { %1969 = vmatpush.bf16.msra.mxu3 %v2924_v48  ;;  %v2757_v48 = vld [vmem:[#allocation8 + $0x78] sm:$0xf0] }
  0xaa   :  { %1942 = vmatpush.bf16.msra.mxu1 %v2788_v44  ;;  %v3060_v44 = vor.u32 %v3430_v63, %v3059_v42  ;;  %1956 = vmatpush.bf16.msra.mxu2 %v2852_v41  ;;  %v3139_v63 = vld [vmem:[#allocation8 + $0x370] sm:$0xf] }
  0xac   :  { %1929 = vmatpush.bf16.msra.mxu0 %v2716_v49  ;;  %v2979_v49 = vld [vmem:[#allocation8 + $0x230] sm:$0xf] }
  0xae   :  { %1943 = vmatpush.bf16.msra.mxu1 %v2780_v53  ;;  %v2980_v53 = vor.u32 %v3410_v50, %v2979_v49  ;;  %1957 = vmatpush.bf16.msra.mxu2 %v2844_v56  ;;  %v3027_v49 = vld [vmem:[#allocation8 + $0x290] sm:$0xf]  ;;  %v3422_v50 = vld [vmem:[#allocation8 + $0x294] sm:$0xf0] }
  0xb0   :  { %1930 = vmatpush.bf16.msra.mxu0 %v2708_v61  ;;  %v2915_v61 = vld [vmem:[#allocation8 + $0x1b0] sm:$0xf] }
  0xb1   :  { %v2916_v2 = vor.u32 %v3394_v62, %v2915_v61  ;;  %v3132_v61 = vor.u32 %v3448_v58, %v3131_v57  ;;  %v2749_v62 = vld [vmem:[#allocation8 + $0x68] sm:$0xf0] }
  0xb2   :  { %1944 = vmatpush.bf16.msra.mxu1 %v2772_v4  ;;  %v3408_v4 = vld [vmem:[#allocation8 + $0x224] sm:$0xf0]  ;;  %1958 = vmatpush.bf16.msra.mxu2 %v2836_v10  ;;  %v3446_v10 = vld [vmem:[#allocation8 + $0x354] sm:$0xf0]  ;;  %v2717_v58 = vld [vmem:[#allocation8 + $0x28] sm:$0xf0] }
  0xb3   :  { %v2972_v6 = vor.u32 %v3408_v4, %v2971_v3  ;;  %1970 = vmatpush.bf16.msra.mxu3 %v2916_v2  ;;  %v3203_v4 = vld [vmem:[#allocation8 + $0x3f0] sm:$0xf] }
  0xb4   :  { %1931 = vmatpush.bf16.msra.mxu0 %v2700_v12  ;;  %v913_v52 = vpop.f32.mrf.mxu0  ;;  %v3426_v12 = vld [vmem:[#allocation8 + $0x2b4] sm:$0xf0] }
  0xb5   :  { %v914_v51 = vadd.f32 %v913_v52, %v238_v37  ;;  %v3044_v14 = vor.u32 %v3426_v12, %v3043_v11  ;;  %v3404_v52 = vld [vmem:[#allocation8 + $0x204] sm:$0xf0] }
  0xb6   :  { %1945 = vmatpush.bf16.msra.mxu1 %v2764_v15  ;;  %v927_v43 = vpop.f32.mrf.mxu1  ;;  %v2907_v15 = vld [vmem:[#allocation8 + $0x1a0] sm:$0xf]  ;;  %v2956_v42 = vor.u32 %v3404_v52, %v2955_v40  ;;  %v3345_v40 = vld [vmem:[#allocation8 + $0x34] sm:$0xf] }
  0xb7   :  { %v928_v5 = vadd.f32 %v927_v43, %v914_v51  ;;  %v2908_v19 = vor.u32 %v3392_v16, %v2907_v15  ;;  %v3450_v43 = vld [vmem:[#allocation8 + $0x374] sm:$0xf0]  ;;  %v3028_v51 = vor.u32 %v3422_v50, %v3027_v49  ;;  %v3195_v15 = vld [vmem:[#allocation8 + $0x3e0] sm:$0xf]  ;;  %v2797_v50 = vld [vmem:[#allocation8 + $0xc8] sm:$0xf0] }
  0xb8   :  { %1980 = vmatpush.bf16.msrb.mxu0 %v3012_v13  ;;  %v3140_v46 = vor.u32 %v3450_v43, %v3139_v63  ;;  %v2725_v63 = vld [vmem:[#allocation8 + $0x38] sm:$0xf0] }
  0xb9   :  { %v1128_v22 = vmax.f32 %v928_v5, 0.0  ;;  %1971 = vmatpush.bf16.msra.mxu3 %v2908_v19  ;;  %v3466_v5 = vld [vmem:[#allocation8 + $0x3f4] sm:$0xf0]  ;;  %v2813_v19 = vld [vmem:[#allocation8 + $0xe8] sm:$0xf0]  ;;  %v2728_v43 = vor.u32 %v3345_v40, %v2725_v63 }
  0xba   :  { %1994 = vmatpush.bf16.msrb.mxu1 %v3076_v17  ;;  %v941_v59 = vpop.f32.mrf.mxu2  ;;  %v3204_v7 = vor.u32 %v3466_v5, %v3203_v4  ;;  %v3454_v40 = vld [vmem:[#allocation8 + $0x394] sm:$0xf0] }
  0xbb   :  { %v942_v0 = vadd.f32 %v941_v59, %v239_v47  ;;  %v3351_v59 = vld [vmem:[#allocation8 + $0x64] sm:$0xf] }
  0xbc   :  { %1981 = vmatpush.bf16.msrb.mxu0 %v3004_v26  ;;  %v955_v1 = vpop.f32.mrf.mxu3  ;;  %v915_v9 = vpop.f32.mrf.mxu0  ;;  %v3372_v26 = vld [vmem:[#allocation8 + $0x104] sm:$0xf0]  ;;  %v2752_v2 = vor.u32 %v3351_v59, %v2749_v62 }
  0xbd   :  { %v916_v13 = vadd.f32 %v915_v9, %v238_v37  ;;  %v956_v17 = vadd.f32 %v955_v1, %v942_v0  ;;  %v2828_v27 = vor.u32 %v3372_v26, %v2827_v25  ;;  %1972 = vmatpush.bf16.msra.mxu3 %v2900_v39  ;;  %v3019_v0 = vld [vmem:[#allocation8 + $0x280] sm:$0xf]  ;;  %v3420_v1 = vld [vmem:[#allocation8 + $0x284] sm:$0xf0]  ;;  %v3123_v9 = vld [vmem:[#allocation8 + $0x350] sm:$0xf] }
  0xbe   :  { %1995 = vmatpush.bf16.msrb.mxu1 %v3068_v29  ;;  %v929_v18 = vpop.f32.mrf.mxu1  ;;  %v3424_v29 = vld [vmem:[#allocation8 + $0x2a4] sm:$0xf0]  ;;  %v3020_v3 = vor.u32 %v3420_v1, %v3019_v0  ;;  %v3124_v12 = vor.u32 %v3446_v10, %v3123_v9  ;;  %v240_v25 = vperm.slane %v3679_v31, 2  ;;  %v3442_v39 = vld [vmem:[#allocation8 + $0x334] sm:$0xf0] }
  0xbf   :  { %v930_v23 = vadd.f32 %v929_v18, %v916_v13  ;;  %v3036_v33 = vor.u32 %v3424_v29, %v3035_v28  ;;  %v1129_v36 = vmax.f32 %v956_v17, 0.0  ;;  %1959 = vmatpush.bf16.msra.mxu2 %v2828_v27  ;;  %v3349_v13 = vld [vmem:[#allocation8 + $0x54] sm:$0xf]  ;;  %v3464_v17 = vld [vmem:[#allocation8 + $0x3e4] sm:$0xf0] }
  0xc0   :  { %1982 = vmatpush.bf16.msrb.mxu0 %v2996_v30  ;;  %v3367_v18 = vld [vmem:[#allocation8 + $0xe4] sm:$0xf]  ;;  %v3196_v20 = vor.u32 %v3464_v17, %v3195_v15  ;;  %v2733_v27 = vld [vmem:[#allocation8 + $0x48] sm:$0xf0]  ;;  %v3171_v0 = vld [vmem:[#allocation8 + $0x3b0] sm:$0xf] }
  0xc1   :  { %v1136_v30 = vmax.f32 %v930_v23, 0.0  ;;  %v2816_v21 = vor.u32 %v3367_v18, %v2813_v19  ;;  %v3444_v23 = vld [vmem:[#allocation8 + $0x344] sm:$0xf0]  ;;  %v3458_v1 = vld [vmem:[#allocation8 + $0x3b4] sm:$0xf0] }
  0xc2   :  { %1996 = vmatpush.bf16.msrb.mxu1 %v3060_v44  ;;  %v943_v32 = vpop.f32.mrf.mxu2  ;;  %v3353_v44 = vld [vmem:[#allocation8 + $0x74] sm:$0xf]  ;;  %v3172_v5 = vor.u32 %v3458_v1, %v3171_v0  ;;  %v3091_v9 = vld [vmem:[#allocation8 + $0x310] sm:$0xf]  ;;  %v3438_v10 = vld [vmem:[#allocation8 + $0x314] sm:$0xf0] }
  0xc3   :  { %v944_v37 = vadd.f32 %v943_v32, %v239_v47  ;;  %v3687_v41 = vpack.c.bf16 %v1136_v30, %v1128_v22  ;;  %v2760_v47 = vor.u32 %v3353_v44, %v2757_v48  ;;  %2008 = vmatpush.bf16.msrb.mxu2 %v3140_v46  ;;  %v3115_v22 = vld [vmem:[#allocation8 + $0x340] sm:$0xf]  ;;  %v3187_v30 = vld [vmem:[#allocation8 + $0x3d0] sm:$0xf]  ;;  %v3462_v32 = vld [vmem:[#allocation8 + $0x3d4] sm:$0xf0] }
  0xc4   :  { %1983 = vmatpush.bf16.msrb.mxu0 %v2988_v38  ;;  %v957_v38 = vpop.f32.mrf.mxu3  ;;  %v3116_v26 = vor.u32 %v3444_v23, %v3115_v22  ;;  %v3188_v35 = vor.u32 %v3462_v32, %v3187_v30  ;;  %v3179_v44 = vld [vmem:[#allocation8 + $0x3c0] sm:$0xf]  ;;  %v3363_v46 = vld [vmem:[#allocation8 + $0xc4] sm:$0xf]  ;;  %v241_v48 = vperm.slane %v3679_v31, 3 }
  0xc5   :  { %v958_v45 = vadd.f32 %v957_v38, %v944_v37  ;;  %1932 = vmatmul.bf16.vlgmr.msra.gmra.mxu0 %v3687_v41  ;;  %v3107_v38 = vld [vmem:[#allocation8 + $0x330] sm:$0xf]  ;;  %v2709_v15 = vld [vmem:[#allocation8 + $0x18] sm:$0xf0]  ;;  %v3163_v17 = vld [vmem:[#allocation8 + $0x3a0] sm:$0xf] }
  0xc6   :  { %1997 = vmatpush.bf16.msrb.mxu1 %v3052_v60  ;;  %v3456_v18 = vld [vmem:[#allocation8 + $0x3a4] sm:$0xf0]  ;;  %v2781_v22 = vld [vmem:[#allocation8 + $0xa8] sm:$0xf0]  ;;  %v2869_v0 = vld [vmem:[#allocation8 + $0x158] sm:$0xf0] }
  0xc7   :  { %v1137_v55 = vmax.f32 %v958_v45, 0.0  ;;  %2009 = vmatpush.bf16.msrb.mxu2 %v3132_v61  ;;  %v3460_v45 = vld [vmem:[#allocation8 + $0x3c4] sm:$0xf0]  ;;  %v2701_v32 = vld [vmem:[#allocation8 + $0x8] sm:$0xf0] }
  0xc8   :  { %1984 = vmatpush.bf16.msrb.mxu0 %v2980_v53  ;;  %v2891_v53 = vld [vmem:[#allocation8 + $0x180] sm:$0xf]  ;;  %v3180_v49 = vor.u32 %v3460_v45, %v3179_v44 }
  0xc9   :  { %v2892_v56 = vor.u32 %v3388_v54, %v2891_v53  ;;  %v3690_v60 = vpack.c.bf16 %v1137_v55, %v1129_v36  ;;  %v2805_v36 = vld [vmem:[#allocation8 + $0xd8] sm:$0xf0]  ;;  %v3440_v53 = vld [vmem:[#allocation8 + $0x324] sm:$0xf0]  ;;  %v3343_v54 = vld [vmem:[#allocation8 + $0x24] sm:$0xf] }
  0xca   :  { %1998 = vmatpush.bf16.msrb.mxu1 %v3044_v14  ;;  %v2741_v14 = vld [vmem:[#allocation8 + $0x58] sm:$0xf0]  ;;  %v2720_v62 = vor.u32 %v3343_v54, %v2717_v58  ;;  %v2765_v54 = vld [vmem:[#allocation8 + $0x88] sm:$0xf0]  ;;  %v3401_v58 = vld [vmem:[#allocation8 + $0x1f4] sm:$0xf] }
  0xcb   :  { %1973 = vmatpush.bf16.msra.mxu3 %v2892_v56  ;;  %1946 = vmatmul.bf16.vlgmr.msra.gmra.mxu1 %v3690_v60  ;;  %v2744_v16 = vor.u32 %v3349_v13, %v2741_v14  ;;  %v3092_v14 = vor.u32 %v3438_v10, %v3091_v9  ;;  %v3397_v9 = vld [vmem:[#allocation8 + $0x1d4] sm:$0xf]  ;;  %v2933_v10 = vld [vmem:[#allocation8 + $0x1d8] sm:$0xf0] }
  0xcc   :  { %1985 = vmatpush.bf16.msrb.mxu0 %v2972_v6  ;;  %v3369_v6 = vld [vmem:[#allocation8 + $0xf4] sm:$0xf]  ;;  %2010 = vmatpush.bf16.msrb.mxu2 %v3124_v12 }
  0xcd   :  { %v2824_v11 = vor.u32 %v3369_v6, %v2821_v8  ;;  %v2789_v6 = vld [vmem:[#allocation8 + $0xb8] sm:$0xf0] }
  0xce   :  { %1999 = vmatpush.bf16.msrb.mxu1 %v3036_v33  ;;  %v3365_v33 = vld [vmem:[#allocation8 + $0xd4] sm:$0xf] }
  0xcf   :  { %2022 = vmatpush.bf16.msrb.mxu3 %v3204_v7  ;;  %v2808_v37 = vor.u32 %v3365_v33, %v2805_v36  ;;  %v3385_v33 = vld [vmem:[#allocation8 + $0x174] sm:$0xf] }
  0xd0   :  { %1986 = vmatpush.bf16.msrb.mxu0 %v2964_v24  ;;  %v3347_v24 = vld [vmem:[#allocation8 + $0x44] sm:$0xf]  ;;  %2011 = vmatpush.bf16.msrb.mxu2 %v3116_v26  ;;  %v3436_v26 = vld [vmem:[#allocation8 + $0x304] sm:$0xf0] }
  0xd1   :  { %v2736_v29 = vor.u32 %v3347_v24, %v2733_v27  ;;  %v3339_v27 = vld [vmem:[#allocation8 + $0x4] sm:$0xf] }
  0xd2   :  { %2000 = vmatpush.bf16.msrb.mxu1 %v3028_v51  ;;  %v3099_v51 = vld [vmem:[#allocation8 + $0x320] sm:$0xf] }
  0xd3   :  { %2023 = vmatpush.bf16.msrb.mxu3 %v3196_v20  ;;  %v3100_v57 = vor.u32 %v3440_v53, %v3099_v51  ;;  %v3164_v20 = vor.u32 %v3456_v18, %v3163_v17  ;;  %v3452_v51 = vld [vmem:[#allocation8 + $0x384] sm:$0xf0]  ;;  %v3355_v53 = vld [vmem:[#allocation8 + $0x84] sm:$0xf] }
  0xd4   :  { %1987 = vmatpush.bf16.msrb.mxu0 %v2956_v42  ;;  %v969_v28 = vpop.f32.mrf.mxu0  ;;  %v3108_v42 = vor.u32 %v3442_v39, %v3107_v38  ;;  %v3155_v39 = vld [vmem:[#allocation8 + $0x390] sm:$0xf]  ;;  %v3395_v18 = vld [vmem:[#allocation8 + $0x1c4] sm:$0xf] }
  0xd5   :  { %v970_v52 = vadd.f32 %v969_v28, %v240_v25  ;;  %v3156_v44 = vor.u32 %v3454_v40, %v3155_v39  ;;  %v3417_v39 = vld [vmem:[#allocation8 + $0x274] sm:$0xf]  ;;  %v3013_v40 = vld [vmem:[#allocation8 + $0x278] sm:$0xf0] }
  0xd6   :  { %2001 = vmatpush.bf16.msrb.mxu1 %v3020_v3  ;;  %v983_v34 = vpop.f32.mrf.mxu1  ;;  %2012 = vmatpush.bf16.msrb.mxu2 %v3108_v42  ;;  %v2773_v42 = vld [vmem:[#allocation8 + $0x98] sm:$0xf0] }
  0xd7   :  { %2024 = vmatpush.bf16.msrb.mxu3 %v3188_v35  ;;  %v984_v55 = vadd.f32 %v983_v34, %v970_v52  ;;  %v2885_v34 = vld [vmem:[#allocation8 + $0x178] sm:$0xf0]  ;;  %v3357_v52 = vld [vmem:[#allocation8 + $0x94] sm:$0xf] }
  0xd8   :  { %2036 = vmatpush.bf16.msra.mxu0 %v2760_v47  ;;  %v2800_v47 = vor.u32 %v3363_v46, %v2797_v50  ;;  %v2888_v38 = vor.u32 %v3385_v33, %v2885_v34  ;;  %v2776_v45 = vor.u32 %v3357_v52, %v2773_v42  ;;  %v3383_v46 = vld [vmem:[#allocation8 + $0x164] sm:$0xf] }
  0xd9   :  { %v1130_v12 = vmax.f32 %v984_v55, 0.0 }
  0xda   :  { %2050 = vmatpush.bf16.msra.mxu1 %v2824_v11  ;;  %v997_v56 = vpop.f32.mrf.mxu2  ;;  %2013 = vmatpush.bf16.msrb.mxu2 %v3100_v57  ;;  %v3341_v11 = vld [vmem:[#allocation8 + $0x14] sm:$0xf]  ;;  %v2768_v57 = vor.u32 %v3355_v53, %v2765_v54 }
  0xdb   :  { %2025 = vmatpush.bf16.msrb.mxu3 %v3180_v49  ;;  %v998_v7 = vadd.f32 %v997_v56, %v241_v48  ;;  %v2877_v49 = vld [vmem:[#allocation8 + $0x168] sm:$0xf0] }
  0xdc   :  { %2037 = vmatpush.bf16.msra.mxu0 %v2752_v2  ;;  %v971_v59 = vpop.f32.mrf.mxu0  ;;  %v1011_v61 = vpop.f32.mrf.mxu3  ;;  %v3361_v2 = vld [vmem:[#allocation8 + $0xb4] sm:$0xf]  ;;  %v2880_v50 = vor.u32 %v3383_v46, %v2877_v49  ;;  %v3371_v49 = vld [vmem:[#allocation8 + $0x104] sm:$0xf] }
  0xdd   :  { %v972_v3 = vadd.f32 %v971_v59, %v240_v25  ;;  %v2792_v8 = vor.u32 %v3361_v2, %v2789_v6  ;;  %v1012_v23 = vadd.f32 %v1011_v61, %v998_v7  ;;  %v3083_v25 = vld [vmem:[#allocation8 + $0x300] sm:$0xf]  ;;  %v2949_v59 = vld [vmem:[#allocation8 + $0x1f8] sm:$0xf0]  ;;  %v3399_v2 = vld [vmem:[#allocation8 + $0x1e4] sm:$0xf] }
  0xde   :  { %2051 = vmatpush.bf16.msra.mxu1 %v2816_v21  ;;  %v985_v4 = vpop.f32.mrf.mxu1  ;;  %2014 = vmatpush.bf16.msrb.mxu2 %v3092_v14  ;;  %v3359_v21 = vld [vmem:[#allocation8 + $0xa4] sm:$0xf]  ;;  %v3084_v30 = vor.u32 %v3436_v26, %v3083_v25  ;;  %v2952_v61 = vor.u32 %v3401_v58, %v2949_v59  ;;  %v2861_v6 = vld [vmem:[#allocation8 + $0x148] sm:$0xf0]  ;;  %v3377_v14 = vld [vmem:[#allocation8 + $0x134] sm:$0xf] }
  0xdf   :  { %v986_v13 = vadd.f32 %v985_v4, %v972_v3  ;;  %2026 = vmatpush.bf16.msrb.mxu3 %v3172_v5  ;;  %v2784_v24 = vor.u32 %v3359_v21, %v2781_v22  ;;  %v1131_v63 = vmax.f32 %v1012_v23, 0.0  ;;  %v2941_v3 = vld [vmem:[#allocation8 + $0x1e8] sm:$0xf0]  ;;  %v3379_v5 = vld [vmem:[#allocation8 + $0x144] sm:$0xf]  ;;  %v243_v23 = vperm.slane %v3679_v31, 5 }
  0xe0   :  { %2038 = vmatpush.bf16.msra.mxu0 %v2744_v16  ;;  %v2712_v16 = vor.u32 %v3341_v11, %v2709_v15  ;;  %v2944_v4 = vor.u32 %v3399_v2, %v2941_v3  ;;  %v2864_v7 = vor.u32 %v3379_v5, %v2861_v6  ;;  %v2853_v15 = vld [vmem:[#allocation8 + $0x138] sm:$0xf0]  ;;  %v3375_v21 = vld [vmem:[#allocation8 + $0x124] sm:$0xf]  ;;  %v2845_v22 = vld [vmem:[#allocation8 + $0x128] sm:$0xf0] }
  0xe1   :  { %v1138_v19 = vmax.f32 %v986_v13, 0.0  ;;  %v3389_v58 = vld [vmem:[#allocation8 + $0x194] sm:$0xf]  ;;  %v2901_v59 = vld [vmem:[#allocation8 + $0x198] sm:$0xf0] }
  0xe2   :  { %2052 = vmatpush.bf16.msra.mxu1 %v2808_v37  ;;  %v2704_v37 = vor.u32 %v3339_v27, %v2701_v32  ;;  %2015 = vmatpush.bf16.msrb.mxu2 %v3084_v30  ;;  %v3393_v27 = vld [vmem:[#allocation8 + $0x1b4] sm:$0xf]  ;;  %v3077_v5 = vld [vmem:[#allocation8 + $0x2f8] sm:$0xf0] }
  0xe3   :  { %v3695_v28 = vpack.c.bf16 %v1138_v19, %v1130_v12  ;;  %2027 = vmatpush.bf16.msrb.mxu3 %v3164_v20  ;;  %v2936_v12 = vor.u32 %v3397_v9, %v2933_v10  ;;  %v2925_v19 = vld [vmem:[#allocation8 + $0x1c8] sm:$0xf0]  ;;  %v3413_v6 = vld [vmem:[#allocation8 + $0x254] sm:$0xf] }
  0xe4   :  { %2039 = vmatpush.bf16.msra.mxu0 %v2736_v29  ;;  %v999_v29 = vpop.f32.mrf.mxu2  ;;  %v1013_v36 = vpop.f32.mrf.mxu3  ;;  %v2928_v20 = vor.u32 %v3395_v18, %v2925_v19  ;;  %v2893_v9 = vld [vmem:[#allocation8 + $0x188] sm:$0xf0] }
  0xe5   :  { %v1000_v35 = vadd.f32 %v999_v29, %v241_v48  ;;  %1960 = vmatmul.bf16.vlgmr.msra.gmra.mxu2 %v3695_v28  ;;  %v2917_v29 = vld [vmem:[#allocation8 + $0x1b8] sm:$0xf0]  ;;  %v2989_v18 = vld [vmem:[#allocation8 + $0x248] sm:$0xf0] }
  0xe6   :  { %2053 = vmatpush.bf16.msra.mxu1 %v2800_v47  ;;  %2064 = vmatpush.bf16.msra.mxu2 %v2888_v38  ;;  %v3147_v47 = vld [vmem:[#allocation8 + $0x380] sm:$0xf]  ;;  %v2920_v33 = vor.u32 %v3393_v27, %v2917_v29  ;;  %v244_v27 = vperm.slane %v3679_v31, 6 }
  0xe7   :  { %2028 = vmatpush.bf16.msrb.mxu3 %v3156_v44  ;;  %v3148_v56 = vor.u32 %v3452_v51, %v3147_v47  ;;  %v2909_v44 = vld [vmem:[#allocation8 + $0x1a8] sm:$0xf0]  ;;  %v3016_v47 = vor.u32 %v3417_v39, %v3013_v40  ;;  %v3415_v51 = vld [vmem:[#allocation8 + $0x264] sm:$0xf]  ;;  %v3425_v39 = vld [vmem:[#allocation8 + $0x2b4] sm:$0xf] }
  0xe8   :  { %2040 = vmatpush.bf16.msra.mxu0 %v2728_v43  ;;  %v1014_v43 = vadd.f32 %v1013_v36, %v1000_v35  ;;  %v3373_v36 = vld [vmem:[#allocation8 + $0x114] sm:$0xf]  ;;  %v3045_v40 = vld [vmem:[#allocation8 + $0x2b8] sm:$0xf0] }
  0xea   :  { %2054 = vmatpush.bf16.msra.mxu1 %v2792_v8  ;;  %v1139_v48 = vmax.f32 %v1014_v43, 0.0  ;;  %2065 = vmatpush.bf16.msra.mxu2 %v2880_v50  ;;  %v242_v8 = vperm.slane %v3679_v31, 4  ;;  %v3391_v43 = vld [vmem:[#allocation8 + $0x1a4] sm:$0xf] }
  0xeb   :  { %2029 = vmatpush.bf16.msrb.mxu3 %v3148_v56 }
  0xec   :  { %2041 = vmatpush.bf16.msra.mxu0 %v2720_v62  ;;  %v3698_v55 = vpack.c.bf16 %v1139_v48, %v1131_v63  ;;  %v3381_v62 = vld [vmem:[#allocation8 + $0x154] sm:$0xf]  ;;  %v2829_v48 = vld [vmem:[#allocation8 + $0x108] sm:$0xf0] }
  0xed   :  { %v2872_v1 = vor.u32 %v3381_v62, %v2869_v0  ;;  %v2832_v53 = vor.u32 %v3371_v49, %v2829_v48  ;;  %v2904_v0 = vor.u32 %v3389_v58, %v2901_v59  ;;  %v3449_v58 = vld [vmem:[#allocation8 + $0x374] sm:$0xf]  ;;  %v3141_v59 = vld [vmem:[#allocation8 + $0x378] sm:$0xf0] }
  0xee   :  { %2055 = vmatpush.bf16.msra.mxu1 %v2784_v24  ;;  %1974 = vmatmul.bf16.vlgmr.msra.gmra.mxu3 %v3698_v55  ;;  %v2848_v24 = vor.u32 %v3375_v21, %v2845_v22  ;;  %v3429_v21 = vld [vmem:[#allocation8 + $0x2d4] sm:$0xf]  ;;  %v3061_v22 = vld [vmem:[#allocation8 + $0x2d8] sm:$0xf0] }
  0xef   :  { %2078 = vmatpush.bf16.msra.mxu3 %v2952_v61  ;;  %2066 = vmatpush.bf16.msra.mxu2 %v2872_v1  ;;  %v3433_v1 = vld [vmem:[#allocation8 + $0x2f4] sm:$0xf] }
  0xf0   :  { %2042 = vmatpush.bf16.msra.mxu0 %v2712_v16  ;;  %v2856_v16 = vor.u32 %v3377_v14, %v2853_v15  ;;  %v3431_v15 = vld [vmem:[#allocation8 + $0x2e4] sm:$0xf] }
  0xf2   :  { %2056 = vmatpush.bf16.msra.mxu1 %v2776_v45  ;;  %v2912_v45 = vor.u32 %v3391_v43, %v2909_v44  ;;  %v245_v43 = vperm.slane %v3679_v31, 7 }
  0xf3   :  { %2079 = vmatpush.bf16.msra.mxu3 %v2944_v4  ;;  %2067 = vmatpush.bf16.msra.mxu2 %v2864_v7  ;;  %v2997_v7 = vld [vmem:[#allocation8 + $0x258] sm:$0xf0] }
  0xf4   :  { %2043 = vmatpush.bf16.msra.mxu0 %v2704_v37  ;;  %v1025_v11 = vpop.f32.mrf.mxu0  ;;  %v2837_v37 = vld [vmem:[#allocation8 + $0x118] sm:$0xf0]  ;;  %v3000_v14 = vor.u32 %v3413_v6, %v2997_v7  ;;  %v3447_v7 = vld [vmem:[#allocation8 + $0x364] sm:$0xf] }
  0xf5   :  { %v1026_v17 = vadd.f32 %v1025_v11, %v242_v8  ;;  %v2840_v52 = vor.u32 %v3373_v36, %v2837_v37 }
  0xf6   :  { %2057 = vmatpush.bf16.msra.mxu1 %v2768_v57  ;;  %v1039_v13 = vpop.f32.mrf.mxu1  ;;  %v3005_v57 = vld [vmem:[#allocation8 + $0x268] sm:$0xf0] }
  0xf7   :  { %2080 = vmatpush.bf16.msra.mxu3 %v2936_v12  ;;  %2068 = vmatpush.bf16.msra.mxu2 %v2856_v16  ;;  %v1040_v25 = vadd.f32 %v1039_v13, %v1026_v17  ;;  %v3008_v4 = vor.u32 %v3415_v51, %v3005_v57  ;;  %v3080_v12 = vor.u32 %v3433_v1, %v3077_v5  ;;  %v3069_v16 = vld [vmem:[#allocation8 + $0x2e8] sm:$0xf0]  ;;  %v3411_v17 = vld [vmem:[#allocation8 + $0x244] sm:$0xf] }
  0xf8   :  { %v3072_v19 = vor.u32 %v3431_v15, %v3069_v16 }
  0xf9   :  { %v1132_v42 = vmax.f32 %v1040_v25, 0.0 }
  0xfa   :  { %v1053_v26 = vpop.f32.mrf.mxu2 }
  0xfb   :  { %2081 = vmatpush.bf16.msra.mxu3 %v2928_v20  ;;  %2069 = vmatpush.bf16.msra.mxu2 %v2848_v24  ;;  %v1054_v38 = vadd.f32 %v1053_v26, %v243_v23  ;;  %v2992_v20 = vor.u32 %v3411_v17, %v2989_v18  ;;  %v2981_v24 = vld [vmem:[#allocation8 + $0x238] sm:$0xf0]  ;;  %v3064_v26 = vor.u32 %v3429_v21, %v3061_v22  ;;  %v3465_v17 = vld [vmem:[#allocation8 + $0x3f4] sm:$0xf] }
  0xfc   :  { %v1027_v30 = vpop.f32.mrf.mxu0  ;;  %v1067_v32 = vpop.f32.mrf.mxu3  ;;  %v3205_v18 = vld [vmem:[#allocation8 + $0x3f8] sm:$0xf0] }
  0xfd   :  { %v1028_v34 = vadd.f32 %v1027_v30, %v242_v8  ;;  %v1068_v50 = vadd.f32 %v1067_v32, %v1054_v38  ;;  %v3387_v8 = vld [vmem:[#allocation8 + $0x184] sm:$0xf] }
  0xfe   :  { %v1041_v35 = vpop.f32.mrf.mxu1  ;;  %v2896_v11 = vor.u32 %v3387_v8, %v2893_v9  ;;  %v3427_v32 = vld [vmem:[#allocation8 + $0x2c4] sm:$0xf]  ;;  %v3133_v8 = vld [vmem:[#allocation8 + $0x368] sm:$0xf0] }
  0xff   :  { %v1042_v63 = vadd.f32 %v1041_v35, %v1028_v34  ;;  %2082 = vmatpush.bf16.msra.mxu3 %v2920_v33  ;;  %2070 = vmatpush.bf16.msra.mxu2 %v2840_v52  ;;  %v1133_v2 = vmax.f32 %v1068_v50, 0.0  ;;  %v3053_v33 = vld [vmem:[#allocation8 + $0x2c8] sm:$0xf0]  ;;  %v3407_v34 = vld [vmem:[#allocation8 + $0x224] sm:$0xf]  ;;  %v3136_v16 = vor.u32 %v3447_v7, %v3133_v8 }
 0x100   :  { %v2973_v35 = vld [vmem:[#allocation8 + $0x228] sm:$0xf0]  ;;  %v3056_v36 = vor.u32 %v3427_v32, %v3053_v33  ;;  %v3405_v52 = vld [vmem:[#allocation8 + $0x214] sm:$0xf] }
 0x101   :  { %v1140_v46 = vmax.f32 %v1042_v63, 0.0  ;;  %v2976_v38 = vor.u32 %v3407_v34, %v2973_v35  ;;  %v3117_v32 = vld [vmem:[#allocation8 + $0x348] sm:$0xf0]  ;;  %v3461_v35 = vld [vmem:[#allocation8 + $0x3d4] sm:$0xf] }
 0x102   :  { %v1055_v56 = vpop.f32.mrf.mxu2 }
 0x103   :  { %v3703_v54 = vpack.c.bf16 %v1140_v46, %v1132_v42  ;;  %v1056_v61 = vadd.f32 %v1055_v56, %v243_v23  ;;  %2083 = vmatpush.bf16.msra.mxu3 %v2912_v45  ;;  %2071 = vmatpush.bf16.msra.mxu2 %v2832_v53  ;;  %v3409_v23 = vld [vmem:[#allocation8 + $0x234] sm:$0xf]  ;;  %v2965_v42 = vld [vmem:[#allocation8 + $0x218] sm:$0xf0]  ;;  %v3048_v46 = vor.u32 %v3425_v39, %v3045_v40  ;;  %v3403_v53 = vld [vmem:[#allocation8 + $0x204] sm:$0xf] }
 0x104   :  { %v1069_v62 = vpop.f32.mrf.mxu3  ;;  %v2984_v30 = vor.u32 %v3409_v23, %v2981_v24  ;;  %v2968_v50 = vor.u32 %v3405_v52, %v2965_v42  ;;  %v2957_v56 = vld [vmem:[#allocation8 + $0x208] sm:$0xf0]  ;;  %v3208_v24 = vor.u32 %v3465_v17, %v3205_v18  ;;  %v3459_v40 = vld [vmem:[#allocation8 + $0x3c4] sm:$0xf] }
 0x105   :  { %1988 = vmatmul.bf16.vlgmr.msrb.gmra.mxu0 %v3703_v54  ;;  %v1070_v3 = vadd.f32 %v1069_v62, %v1056_v61  ;;  %v2960_v1 = vor.u32 %v3403_v53, %v2957_v56  ;;  %v3181_v52 = vld [vmem:[#allocation8 + $0x3c8] sm:$0xf0]  ;;  %v3439_v42 = vld [vmem:[#allocation8 + $0x324] sm:$0xf] }
 0x106   :  { %2092 = vmatpush.bf16.msrb.mxu0 %v3016_v47  ;;  %v3037_v47 = vld [vmem:[#allocation8 + $0x2a8] sm:$0xf0] }
 0x107   :  { %v1141_v10 = vmax.f32 %v1070_v3, 0.0  ;;  %2084 = vmatpush.bf16.msra.mxu3 %v2904_v0  ;;  %v3029_v3 = vld [vmem:[#allocation8 + $0x298] sm:$0xf0]  ;;  %v3085_v53 = vld [vmem:[#allocation8 + $0x308] sm:$0xf0] }
 0x109   :  { %v3706_v13 = vpack.c.bf16 %v1141_v10, %v1133_v2  ;;  %v3421_v2 = vld [vmem:[#allocation8 + $0x294] sm:$0xf] }
 0x10a   :  { %2093 = vmatpush.bf16.msrb.mxu0 %v3008_v4  ;;  %v3144_v4 = vor.u32 %v3449_v58, %v3141_v59  ;;  %v3157_v58 = vld [vmem:[#allocation8 + $0x398] sm:$0xf0] }
 0x10b   :  { %2002 = vmatmul.bf16.vlgmr.msrb.gmra.mxu1 %v3706_v13  ;;  %2085 = vmatpush.bf16.msra.mxu3 %v2896_v11 }
 0x10c   :  { %2106 = vmatpush.bf16.msrb.mxu1 %v3080_v12  ;;  %v3419_v12 = vld [vmem:[#allocation8 + $0x284] sm:$0xf] }
 0x10e   :  { %2094 = vmatpush.bf16.msrb.mxu0 %v3000_v14  ;;  %v3021_v14 = vld [vmem:[#allocation8 + $0x288] sm:$0xf0] }
 0x10f   :  { %v3024_v23 = vor.u32 %v3419_v12, %v3021_v14  ;;  %v86_v12 = vld [vmem:[#allocation2] sm:$0xff] }
 0x110   :  { %2107 = vmatpush.bf16.msrb.mxu1 %v3072_v19  ;;  %v3445_v19 = vld [vmem:[#allocation8 + $0x354] sm:$0xf]  ;;  %v88_v17 = vunpack.c.l.bf16 %v86_v12 }
 0x112   :  { %2095 = vmatpush.bf16.msrb.mxu0 %v2992_v20  ;;  %v3125_v20 = vld [vmem:[#allocation8 + $0x358] sm:$0xf0] }
 0x114   :  { %v1081_v25 = vpop.f32.mrf.mxu0  ;;  %2108 = vmatpush.bf16.msrb.mxu1 %v3064_v26  ;;  %v3128_v26 = vor.u32 %v3445_v19, %v3125_v20 }
 0x115   :  { %2044 = vmatmul.bf16.vlgmr.msra.gmra.mxu0 %v3687_v41  ;;  %v1082_v37 = vadd.f32 %v1081_v25, %v244_v27  ;;  %v3423_v41 = vld [vmem:[#allocation8 + $0x2a4] sm:$0xf] }
 0x116   :  { %v1095_v29 = vpop.f32.mrf.mxu1  ;;  %2096 = vmatpush.bf16.msrb.mxu0 %v2984_v30  ;;  %v3040_v31 = vor.u32 %v3423_v41, %v3037_v47  ;;  %v3443_v30 = vld [vmem:[#allocation8 + $0x344] sm:$0xf]  ;;  %v3165_v47 = vld [vmem:[#allocation8 + $0x3a8] sm:$0xf0] }
 0x117   :  { %v1096_v49 = vadd.f32 %v1095_v29, %v1082_v37  ;;  %v3197_v29 = vld [vmem:[#allocation8 + $0x3e8] sm:$0xf0]  ;;  %v3120_v34 = vor.u32 %v3443_v30, %v3117_v32  ;;  %v3109_v37 = vld [vmem:[#allocation8 + $0x338] sm:$0xf0]  ;;  %v3455_v41 = vld [vmem:[#allocation8 + $0x3a4] sm:$0xf] }
 0x118   :  { %2109 = vmatpush.bf16.msrb.mxu1 %v3056_v36  ;;  %v3189_v36 = vld [vmem:[#allocation8 + $0x3d8] sm:$0xf0]  ;;  %v3168_v56 = vor.u32 %v3455_v41, %v3165_v47 }
 0x119   :  { %v1134_v62 = vmax.f32 %v1096_v49, 0.0  ;;  %v3437_v49 = vld [vmem:[#allocation8 + $0x314] sm:$0xf] }
 0x11a   :  { %v1109_v63 = vpop.f32.mrf.mxu2  ;;  %2097 = vmatpush.bf16.msrb.mxu0 %v2976_v38  ;;  %v3192_v38 = vor.u32 %v3461_v35, %v3189_v36 }
 0x11b   :  { %2058 = vmatmul.bf16.vlgmr.msra.gmra.mxu1 %v3690_v60  ;;  %v1110_v61 = vadd.f32 %v1109_v63, %v245_v43  ;;  %v3032_v60 = vor.u32 %v3421_v2, %v3029_v3  ;;  %v3101_v63 = vld [vmem:[#allocation8 + $0x328] sm:$0xf0] }
 0x11c   :  { %v1123_v44 = vpop.f32.mrf.mxu3  ;;  %v1083_v45 = vpop.f32.mrf.mxu0  ;;  %2110 = vmatpush.bf16.msrb.mxu1 %v3048_v46  ;;  %v3173_v46 = vld [vmem:[#allocation8 + $0x3b8] sm:$0xf0] }
 0x11d   :  { %v1084_v48 = vadd.f32 %v1083_v45, %v244_v27  ;;  %v1124_v9 = vadd.f32 %v1123_v44, %v1110_v61  ;;  %v3463_v27 = vld [vmem:[#allocation8 + $0x3e4] sm:$0xf]  ;;  %v3104_v44 = vor.u32 %v3439_v42, %v3101_v63  ;;  %v3457_v45 = vld [vmem:[#allocation8 + $0x3b4] sm:$0xf] }
 0x11e   :  { %v1097_v51 = vpop.f32.mrf.mxu1  ;;  %2098 = vmatpush.bf16.msrb.mxu0 %v2968_v50  ;;  %v3200_v33 = vor.u32 %v3463_v27, %v3197_v29  ;;  %v3451_v61 = vld [vmem:[#allocation8 + $0x384] sm:$0xf] }
 0x11f   :  { %v1098_v57 = vadd.f32 %v1097_v51, %v1084_v48  ;;  %v1135_v21 = vmax.f32 %v1124_v9, 0.0  ;;  %v3176_v48 = vor.u32 %v3457_v45, %v3173_v46  ;;  %v3435_v51 = vld [vmem:[#allocation8 + $0x304] sm:$0xf] }
 0x120   :  { %2111 = vmatpush.bf16.msrb.mxu1 %v3040_v31  ;;  %v3149_v31 = vld [vmem:[#allocation8 + $0x388] sm:$0xf0] }
 0x121   :  { %v1142_v0 = vmax.f32 %v1098_v57, 0.0  ;;  %v3453_v57 = vld [vmem:[#allocation8 + $0x394] sm:$0xf] }
 0x122   :  { %v1111_v6 = vpop.f32.mrf.mxu2  ;;  %2099 = vmatpush.bf16.msrb.mxu0 %v2960_v1  ;;  %v3160_v59 = vor.u32 %v3453_v57, %v3157_v58 }
 0x123   :  { %v3713_v5 = vpack.c.bf16 %v1142_v0, %v1134_v62  ;;  %v1112_v10 = vadd.f32 %v1111_v6, %v245_v43  ;;  %v3184_v43 = vor.u32 %v3459_v40, %v3181_v52  ;;  %v3152_v62 = vor.u32 %v3451_v61, %v3149_v31 }
 0x124   :  { %v1125_v11 = vpop.f32.mrf.mxu3  ;;  %2112 = vmatpush.bf16.msrb.mxu1 %v3032_v60 }
 0x125   :  { %2016 = vmatmul.bf16.vlgmr.msrb.gmra.mxu2 %v3713_v5  ;;  %v1126_v15 = vadd.f32 %v1125_v11, %v1112_v10  ;;  %2100 = vmatmul.bf16.vlgmr.msrb.gmra.mxu0 %v3703_v54  ;;  %v3441_v54 = vld [vmem:[#allocation8 + $0x334] sm:$0xf] }
 0x126   :  { %2120 = vmatpush.bf16.msrb.mxu2 %v3144_v4  ;;  %v3112_v39 = vor.u32 %v3441_v54, %v3109_v37 }
 0x127   :  { %v1143_v22 = vmax.f32 %v1126_v15, 0.0 }
 0x128   :  { %2113 = vmatpush.bf16.msrb.mxu1 %v3024_v23 }
 0x129   :  { %v1155_v25 = vpack.c.bf16 %v1143_v22, %v1135_v21 }
 0x12a   :  { %2121 = vmatpush.bf16.msrb.mxu2 %v3136_v16 }
 0x12b   :  { %2030 = vmatmul.bf16.vlgmr.msrb.gmra.mxu3 %v1155_v25  ;;  %2114 = vmatmul.bf16.vlgmr.msrb.gmra.mxu1 %v3706_v13  ;;  %v3093_v13 = vld [vmem:[#allocation8 + $0x318] sm:$0xf0] }
 0x12c   :  { %2134 = vmatpush.bf16.msrb.mxu3 %v3208_v24  ;;  %v3096_v50 = vor.u32 %v3437_v49, %v3093_v13 }
 0x12e   :  { %2122 = vmatpush.bf16.msrb.mxu2 %v3128_v26  ;;  %v87_v26 = vld [vmem:[#allocation2 + $0x8] sm:$0xff] }
 0x12f   :  { %v90_v35 = vunpack.c.l.bf16 %v87_v26 }
 0x130   :  { %2135 = vmatpush.bf16.msrb.mxu3 %v3200_v33 }
 0x132   :  { %2123 = vmatpush.bf16.msrb.mxu2 %v3120_v34 }
 0x134   :  { %2136 = vmatpush.bf16.msrb.mxu3 %v3192_v38 }
 0x135   :  { %2072 = vmatmul.bf16.vlgmr.msra.gmra.mxu2 %v3695_v28  ;;  %v3088_v28 = vor.u32 %v3435_v51, %v3085_v53 }
 0x136   :  { %2124 = vmatpush.bf16.msrb.mxu2 %v3112_v39 }
 0x138   :  { %2137 = vmatpush.bf16.msrb.mxu3 %v3184_v43 }
 0x13a   :  { %2125 = vmatpush.bf16.msrb.mxu2 %v3104_v44 }
 0x13b   :  { %2086 = vmatmul.bf16.vlgmr.msra.gmra.mxu3 %v3698_v55 }
 0x13c   :  { %2138 = vmatpush.bf16.msrb.mxu3 %v3176_v48 }
 0x13e   :  { %2126 = vmatpush.bf16.msrb.mxu2 %v3096_v50 }
 0x140   :  { %2139 = vmatpush.bf16.msrb.mxu3 %v3168_v56 }
 0x142   :  { %2127 = vmatpush.bf16.msrb.mxu2 %v3088_v28  ;;  %v1933_v0 = vpop.f32.mrf.mxu0  ;;  %v89_v28 = vunpack.c.h.bf16 %v86_v12 }
 0x144   :  { %2140 = vmatpush.bf16.msrb.mxu3 %v3160_v59 }
 0x145   :  { %2128 = vmatmul.bf16.vlgmr.msrb.gmra.mxu2 %v3713_v5  ;;  %v3724_v5 = vld [vmem:[%s3735_s4] sm:$0x3]  ;;  %s3614_s4 = smov [#allocation10]  }
 0x146   :  { %v94_v18 = vperm.slane %v3724_v5, 0  ;;  %v95_v57 = vperm.slane %v3724_v5, 1  ;;  %s2160_s15 = sshll.u32 %s3614_s4, 4  ;;  %s2161_s15 = int_to_ptr.vmem [resolvable:$true] %s2160_s15 }
 0x148   :  { %2141 = vmatpush.bf16.msrb.mxu3 %v3152_v62  ;;  %v1947_v1 = vpop.f32.mrf.mxu1  ;;  %v98_v24 = vadd.f32 %v94_v18, %v88_v17  ;;  %v100_v38 = vadd.f32 %v94_v18, %v90_v35  ;;  %v99_v31 = vadd.f32 %v95_v57, %v89_v28 }
 0x149   :  { %v1948_v9 = vadd.f32 %v1947_v1, %v1933_v0 }
 0x14a   :  { %v1935_v55 = vpop.f32.mrf.mxu0 }
 0x14b   :  { %2142 = vmatmul.bf16.vlgmr.msrb.gmra.mxu3 %v1155_v25 }
 0x150   :  { %v1949_v3 = vpop.f32.mrf.mxu1 }
 0x151   :  { %v1950_v20 = vadd.f32 %v1949_v3, %v1935_v55  ;;  %v91_v3 = vunpack.c.h.bf16 %v87_v26 }
 0x168   :  { %v1961_v2 = vpop.f32.mrf.mxu2 }
 0x169   :  { %v1962_v10 = vadd.f32 %v1961_v2, %v1948_v9  ;;  %v101_v9 = vadd.f32 %v95_v57, %v91_v3 }
 0x170   :  { %v1963_v7 = vpop.f32.mrf.mxu2 }
 0x171   :  { %v1975_v4 = vpop.f32.mrf.mxu3  ;;  %v1964_v22 = vadd.f32 %v1963_v7, %v1950_v20 }
 0x172   :  { %v1976_v14 = vadd.f32 %v1975_v4, %v1962_v10 }
 0x179   :  { %v1977_v60 = vpop.f32.mrf.mxu3 }
 0x17a   :  { %v1978_v27 = vadd.f32 %v1977_v60, %v1964_v22 }
 0x182   :  { %v1989_v6 = vpop.f32.mrf.mxu0 }
 0x183   :  { %v1990_v16 = vadd.f32 %v1989_v6, %v1976_v14 }
 0x188   :  { %v2003_v8 = vpop.f32.mrf.mxu1 }
 0x189   :  { %v2004_v21 = vadd.f32 %v2003_v8, %v1990_v16 }
 0x18a   :  { %v1991_v11 = vpop.f32.mrf.mxu0 }
 0x18b   :  { %v1992_v33 = vadd.f32 %v1991_v11, %v1978_v27 }
 0x190   :  { %v2005_v19 = vpop.f32.mrf.mxu1 }
 0x191   :  { %v2006_v36 = vadd.f32 %v2005_v19, %v1992_v33 }
 0x192   :  { %v2045_v32 = vpop.f32.mrf.mxu0 }
 0x198   :  { %v2059_v54 = vpop.f32.mrf.mxu1 }
 0x199   :  { %v2060_v45 = vadd.f32 %v2059_v54, %v2045_v32 }
 0x19a   :  { %v2047_v63 = vpop.f32.mrf.mxu0 }
 0x1a0   :  { %v2061_v43 = vpop.f32.mrf.mxu1 }
 0x1a1   :  { %v2062_v41 = vadd.f32 %v2061_v43, %v2047_v63 }
 0x1a2   :  { %v2101_v48 = vpop.f32.mrf.mxu0 }
 0x1a8   :  { %v2017_v15 = vpop.f32.mrf.mxu2  ;;  %v2115_v51 = vpop.f32.mrf.mxu1 }
 0x1a9   :  { %v2018_v23 = vadd.f32 %v2017_v15, %v2004_v21 }
 0x1aa   :  { %v2103_v62 = vpop.f32.mrf.mxu0 }
 0x1ae   :  { %v2031_v25 = vpop.f32.mrf.mxu3 }
 0x1af   :  { %v2032_v29 = vadd.f32 %v2031_v25, %v2018_v23 }
 0x1b0   :  { %v2019_v30 = vpop.f32.mrf.mxu2  ;;  %v2117_v4 = vpop.f32.mrf.mxu1 }
 0x1b1   :  { %v2148_v34 = vadd.f32 %v2032_v29, %v98_v24  ;;  %v2020_v37 = vadd.f32 %v2019_v30, %v2006_v36 }
 0x1b3   :  { %2152 = vst [vmem:[#allocation10] sm:$0xff] %v2148_v34 }
 0x1b6   :  { %v2033_v39 = vpop.f32.mrf.mxu3 }
 0x1b7   :  { %v2034_v40 = vadd.f32 %v2033_v39, %v2020_v37 }
 0x1b8   :  { %v2073_v52 = vpop.f32.mrf.mxu2 }
 0x1b9   :  { %v2150_v42 = vadd.f32 %v2034_v40, %v100_v38  ;;  %v2074_v49 = vadd.f32 %v2073_v52, %v2060_v45 }
 0x1bb   :  { %2154 = vst [vmem:[#allocation10 + $0x10] sm:$0xff] %v2150_v42 }
 0x1be   :  { %v2087_v44 = vpop.f32.mrf.mxu3 }
 0x1bf   :  { %v2088_v13 = vadd.f32 %v2087_v44, %v2074_v49 }
 0x1c0   :  { %v2075_v46 = vpop.f32.mrf.mxu2 }
 0x1c1   :  { %v2102_v47 = vadd.f32 %v2101_v48, %v2088_v13  ;;  %v2076_v56 = vadd.f32 %v2075_v46, %v2062_v41 }
 0x1c3   :  { %v2116_v59 = vadd.f32 %v2115_v51, %v2102_v47 }
 0x1c6   :  { %v2089_v50 = vpop.f32.mrf.mxu3 }
 0x1c7   :  { %v2090_v58 = vadd.f32 %v2089_v50, %v2076_v56 }
 0x1c8   :  { %v2129_v53 = vpop.f32.mrf.mxu2 }
 0x1c9   :  { %v2130_v61 = vadd.f32 %v2129_v53, %v2116_v59  ;;  %v2104_v1 = vadd.f32 %v2103_v62, %v2090_v58 }
 0x1cb   :  { %v2118_v7 = vadd.f32 %v2117_v4, %v2104_v1 }
 0x1ce   :  { %v2143_v0 = vpop.f32.mrf.mxu3 }
 0x1cf   :  { %v2144_v55 = vadd.f32 %v2143_v0, %v2130_v61 }
 0x1d0   :  { %v2131_v6 = vpop.f32.mrf.mxu2 }
 0x1d1   :  { %v2149_v2 = vadd.f32 %v2144_v55, %v99_v31  ;;  %v2132_v8 = vadd.f32 %v2131_v6, %v2118_v7 }
 0x1d3   :  { %2153 = vst [vmem:[#allocation10 + $0x8] sm:$0xff] %v2149_v2 }
 0x1d6   :  { %v2145_v10 = vpop.f32.mrf.mxu3 }
 0x1d7   :  { %v2146_v60 = vadd.f32 %v2145_v10, %v2132_v8 }
 0x1d9   :  { %v2151_v11 = vadd.f32 %v2146_v60, %v101_v9 }
 0x1db   :  { %2155 = vst [vmem:[#allocation10 + $0x18] sm:$0xff] %v2151_v11 }
 0x1dc   :  { %2168 = dma.vmem_to_hbm [thread:$0]  %s2161_s15, 512, %s2163_s18, [#allocation4], %s3615_s19, %s3615_s19, %s3616_s20  }
 0x1dd   :  { %3604 = dma.done.wait [#allocation4], 512  }
 0x1de   :  { %3605 = vsyncadd [#allocation4], 4294966784 }
 0x1df   :  { %2173 = vsyncpa [#allocation3], 1 }
 0x1e0   :  { %2174 = vsyncpa [#allocation6], 1 }
 0x1e1   :  { %2175 = vsyncpa [#allocation9], 1 }
 0x1e2   :  { %2176 = vsyncpa [#allocation4], 1 }

</bundles_post_ra>
